<compile_context>
chip_gen: v5e
topology: v5e:2x2
jax: 0.10.0
libtpu: 0.0.40
codegen_flags: <defaults>
</compile_context>

<pallas_src>
import jax
import jax.numpy as jnp
from jax.experimental import pallas as pl
from jax.experimental.pallas import tpu as pltpu

NUM_CLASSES = 10
BN_EPS = 1e-5
IN_FEATURES = 784
IN_PADDED = 896            # 7 * 128: lane-aligned K for the dominant first matmul
OUT_PADDED = 128           # lane-dense output slab; real classes live in [:, :10]
NEG_PAD = -1e30            # f32 bias of padded class columns -> exp() underflows to 0
HIDDEN = (512, 256, 128, 64)          # logical hidden widths (PyTorch module)
HIDDEN_PADDED = (512, 256, 128, 128)  # last hidden padded 64 -> 128 for lane density


def mlp_kernel(x_ref,
               w0_ref, b0_ref, w1_ref, b1_ref, w2_ref, b2_ref,
               w3_ref, b3_ref, w4_ref, b4_ref,
               o_ref):
    """One batch tile of the full MLP; weights stay VMEM-resident across tiles."""

    def lin_relu(h, w_ref, b_ref):
        # bf16 x bf16 matmul on the MXU, f32 accumulation; bias + ReLU in f32.
        y = jnp.dot(h, w_ref[...], preferred_element_type=jnp.float32) + b_ref[...]
        return jnp.maximum(y, 0.0).astype(jnp.bfloat16)

    h = x_ref[...]                       # (TB, 896) bf16, zero-padded features
    h = lin_relu(h, w0_ref, b0_ref)      # 896 -> 512  (BN folded into W/b)
    # dropout(p=0.3) -> identity in eval mode
    h = lin_relu(h, w1_ref, b1_ref)      # 512 -> 256
    h = lin_relu(h, w2_ref, b2_ref)      # 256 -> 128
    # dropout(p=0.3) -> identity in eval mode
    h = lin_relu(h, w3_ref, b3_ref)      # 128 -> 128 (64 real + 64 zero-padded cols)

    # Final Linear into a lane-dense 128-wide slab; padded class columns have
    # zero weights and NEG_PAD (f32) bias, so they never influence the normalizer.
    logits = jnp.dot(h, w4_ref[...], preferred_element_type=jnp.float32) + b4_ref[...]
    m = jnp.max(logits, axis=1, keepdims=True)
    z = logits - m
    lse = jnp.log(jnp.sum(jnp.exp(z), axis=1, keepdims=True))
    o_ref[...] = (z - lse).astype(o_ref.dtype)


def _round_up(x, m):
    return (x + m - 1) // m * m


def _pick_tile(batch):
    """Pick a batch tile (multiple of 16) minimizing batch padding waste, then
    ensure >=2 grid steps along the parallel axis when possible (v7x: 2 TCs)."""
    cands = [512, 256, 128, 64]
    if batch < 64:
        cands.append(max(16, _round_up(batch, 16)))
    best_tb, best_pad = None, None
    for tb in cands:
        pad = _round_up(batch, tb)
        if best_pad is None or pad < best_pad or (pad == best_pad and tb > best_tb):
            best_tb, best_pad = tb, pad
    tb, b_pad = best_tb, best_pad
    if b_pad // tb < 2:
        half = tb // 2
        if half >= 16 and half % 16 == 0 and b_pad % half == 0:
            tb = half
    return tb, b_pad


def mlp_forward(x, kernel_params):
    """x: (B, ...) with prod(...) == 784. Returns (B, NUM_CLASSES) f32 log-probs."""
    batch = x.shape[0]
    tb, b_pad = _pick_tile(batch)

    # Build the padded bf16 input directly: cast once, one pad op, no f32 slab.
    x_flat = x.reshape(batch, -1).astype(jnp.bfloat16)
    x_padded = jnp.pad(x_flat,
                       ((0, b_pad - batch), (0, IN_PADDED - IN_FEATURES)))

    in_specs = [pl.BlockSpec((tb, IN_PADDED), lambda i: (i, 0))]
    for p in kernel_params:
        # Full-array blocks with a constant index_map: weights/biases are DMA'd
        # once and stay resident in VMEM across all batch tiles.
        in_specs.append(pl.BlockSpec(p.shape, lambda i: (0, 0)))
    out_spec = pl.BlockSpec((tb, OUT_PADDED), lambda i: (i, 0))

    dims = (IN_PADDED,) + HIDDEN_PADDED + (OUT_PADDED,)
    flops = 2 * b_pad * sum(dims[i] * dims[i + 1] for i in range(5))
    bytes_accessed = (x_padded.size * 2 + b_pad * OUT_PADDED * 4 +
                      sum(int(p.size) * p.dtype.itemsize for p in kernel_params))
    cost = pl.CostEstimate(flops=flops,
                           transcendentals=b_pad * (OUT_PADDED + 1),
                           bytes_accessed=bytes_accessed)

    out = pl.pallas_call(
        mlp_kernel,
        out_shape=jax.ShapeDtypeStruct((b_pad, OUT_PADDED), jnp.float32),
        grid=(b_pad // tb,),
        in_specs=in_specs,
        out_specs=out_spec,
        compiler_params=pltpu.CompilerParams(
            dimension_semantics=("parallel",)),
        cost_estimate=cost,
    )(x_padded, *kernel_params)

    return out[:batch, :NUM_CLASSES]


def make_raw_params(key):
    """Raw PyTorch-style parameters: Linear W (out,in), b (out,), BN running stats."""
    dims = [IN_FEATURES] + list(HIDDEN) + [NUM_CLASSES]
    layers = []
    for i in range(5):
        d_in, d_out = dims[i], dims[i + 1]
        key, kw, kb = jax.random.split(key, 3)
        bound = 1.0 / jnp.sqrt(d_in)
        w = jax.random.uniform(kw, (d_out, d_in), jnp.float32, -bound, bound)
        b = jax.random.uniform(kb, (d_out,), jnp.float32, -bound, bound)
        if i < 4:
            key, k1, k2, k3, k4 = jax.random.split(key, 5)
            gamma = jax.random.uniform(k1, (d_out,), jnp.float32, 0.8, 1.2)
            beta = 0.1 * jax.random.normal(k2, (d_out,), jnp.float32)
            mean = 0.1 * jax.random.normal(k3, (d_out,), jnp.float32)
            var = jax.random.uniform(k4, (d_out,), jnp.float32, 0.8, 1.2)
            layers.append((w, b, gamma, beta, mean, var))
        else:
            layers.append((w, b))
    return layers


def fold_params(raw_layers):
    """One-time fold of inference BatchNorm into Linear, pad to lane-aligned
    shapes, transpose to (in,out), and cast weights to bf16 for the kernel."""
    params = []
    for i, layer in enumerate(raw_layers):
        if i < 4:
            w, b, gamma, beta, mean, var = layer
            s = gamma / jnp.sqrt(var + BN_EPS)          # (d_out,)
            t = beta - mean * s
            w_f = w.T * s[None, :]                      # (d_in, d_out)
            b_f = b * s + t
        else:
            w, b = layer
            w_f = w.T                                   # (64, 10)
            b_f = b
        if i == 0:
            # Zero rows match the zero-padded input feature columns (784->896).
            w_f = jnp.pad(w_f, ((0, IN_PADDED - IN_FEATURES), (0, 0)))
        if i == 3:
            # Pad last hidden 64 -> 128: zero weight columns, zero bias (ReLU(0)=0).
            w_f = jnp.pad(w_f, ((0, 0), (0, 128 - HIDDEN[3])))
            b_f = jnp.pad(b_f, ((0, 128 - HIDDEN[3]),))
        if i == 4:
            # Match padded input rows (64->128, zero rows) and pad classes
            # 10 -> 128: zero weight columns, NEG_PAD (f32) bias.
            w_f = jnp.pad(w_f, ((0, 128 - HIDDEN[3]),
                                (0, OUT_PADDED - NUM_CLASSES)))
            b_f = jnp.concatenate(
                [b_f, jnp.full((OUT_PADDED - NUM_CLASSES,), NEG_PAD, jnp.float32)])
        params.append(w_f.astype(jnp.bfloat16))
        params.append(b_f.reshape(1, -1).astype(jnp.float32))
    return params


def reference_forward(x, raw_layers):
    """Pure-JAX f32 reference matching PyTorch eval-mode semantics."""
    h = x.reshape(x.shape[0], -1).astype(jnp.float32)
    for i in range(4):
        w, b, gamma, beta, mean, var = raw_layers[i]
        y = h @ w.T + b
        y = (y - mean) / jnp.sqrt(var + BN_EPS) * gamma + beta
        h = jnp.maximum(y, 0.0)
    w, b = raw_layers[4]
    logits = h @ w.T + b
    return jax.nn.log_softmax(logits, axis=1)


if __name__ == "__main__":
    key = jax.random.PRNGKey(0)
    key, kx = jax.random.split(key)

    # MNIST-like input: (batch=8, 1, 28, 28).
    x = jax.random.normal(kx, (8, 1, 28, 28), jnp.float32)

    raw = make_raw_params(key)
    params = fold_params(raw)

    out = jax.block_until_ready(mlp_forward(x, params))
    ref = reference_forward(x, raw)

    assert out.shape == (8, NUM_CLASSES)
    # bf16 weights/activations -> looser tolerance vs the f32 reference.
    assert jnp.allclose(out, ref, atol=7e-2, rtol=7e-2), (
        f"mismatch vs JAX reference, max abs diff = {jnp.max(jnp.abs(out - ref))}")

    print("KERNEL_OK")
</pallas_src>

<mosaic_0001>
module attributes {stable_mosaic.version = 11 : i64} {
  func.func @mlp_kernel(%arg0: i32, %arg1: memref<16x896xbf16, #tpu.memory_space<vmem>>, %arg2: memref<896x512xbf16, #tpu.memory_space<vmem>>, %arg3: memref<1x512xf32, #tpu.memory_space<vmem>>, %arg4: memref<512x256xbf16, #tpu.memory_space<vmem>>, %arg5: memref<1x256xf32, #tpu.memory_space<vmem>>, %arg6: memref<256x128xbf16, #tpu.memory_space<vmem>>, %arg7: memref<1x128xf32, #tpu.memory_space<vmem>>, %arg8: memref<128x128xbf16, #tpu.memory_space<vmem>>, %arg9: memref<1x128xf32, #tpu.memory_space<vmem>>, %arg10: memref<128x128xbf16, #tpu.memory_space<vmem>>, %arg11: memref<1x128xf32, #tpu.memory_space<vmem>>, %arg12: memref<16x128xf32, #tpu.memory_space<vmem>>) attributes {dimension_semantics = [#tpu.dimension_semantics<parallel>], iteration_bounds = array<i64: 1>, scalar_prefetch = 0 : i64, scratch_operands = 0 : i64, tpu.core_type = #tpu.core_type<tc>, window_params = [{transform_indices = @transform_0, window_bounds = array<i64: 16, 896>}, {pipeline_mode = #tpu.pipeline_mode<synchronous>, transform_indices = @transform_1, window_bounds = array<i64: 896, 512>}, {pipeline_mode = #tpu.pipeline_mode<synchronous>, transform_indices = @transform_2, window_bounds = array<i64: 1, 512>}, {pipeline_mode = #tpu.pipeline_mode<synchronous>, transform_indices = @transform_3, window_bounds = array<i64: 512, 256>}, {pipeline_mode = #tpu.pipeline_mode<synchronous>, transform_indices = @transform_4, window_bounds = array<i64: 1, 256>}, {pipeline_mode = #tpu.pipeline_mode<synchronous>, transform_indices = @transform_5, window_bounds = array<i64: 256, 128>}, {pipeline_mode = #tpu.pipeline_mode<synchronous>, transform_indices = @transform_6, window_bounds = array<i64: 1, 128>}, {pipeline_mode = #tpu.pipeline_mode<synchronous>, transform_indices = @transform_7, window_bounds = array<i64: 128, 128>}, {pipeline_mode = #tpu.pipeline_mode<synchronous>, transform_indices = @transform_8, window_bounds = array<i64: 1, 128>}, {pipeline_mode = #tpu.pipeline_mode<synchronous>, transform_indices = @transform_9, window_bounds = array<i64: 128, 128>}, {pipeline_mode = #tpu.pipeline_mode<synchronous>, transform_indices = @transform_10, window_bounds = array<i64: 1, 128>}, {transform_indices = @transform_11, window_bounds = array<i64: 16, 128>}]} {
    %c0 = arith.constant 0 : index
    %c0_0 = arith.constant 0 : index
    %0 = vector.load %arg1[%c0, %c0_0] : memref<16x896xbf16, #tpu.memory_space<vmem>>, vector<16x896xbf16>
    %c0_1 = arith.constant 0 : index
    %c0_2 = arith.constant 0 : index
    %1 = vector.load %arg2[%c0_1, %c0_2] : memref<896x512xbf16, #tpu.memory_space<vmem>>, vector<896x512xbf16>
    %cst = arith.constant dense<0.000000e+00> : vector<16x512xf32>
    %2 = tpu.matmul %0, %1, %cst {dimension_numbers = #tpu.dot_dimension_numbers<[1], [0], [0], [1], [0, 0, 1, 1], [], []>} : vector<16x896xbf16>, vector<896x512xbf16>, vector<16x512xf32> -> vector<16x512xf32>
    %c0_3 = arith.constant 0 : index
    %c0_4 = arith.constant 0 : index
    %3 = vector.load %arg3[%c0_3, %c0_4] : memref<1x512xf32, #tpu.memory_space<vmem>>, vector<1x512xf32>
    %4 = vector.broadcast %3 : vector<1x512xf32> to vector<16x512xf32>
    %5 = arith.addf %2, %4 : vector<16x512xf32>
    %cst_5 = arith.constant 0.000000e+00 : f32
    %6 = vector.broadcast %cst_5 : f32 to vector<16x512xf32>
    %7 = arith.maximumf %5, %6 : vector<16x512xf32>
    %8 = arith.truncf %7 : vector<16x512xf32> to vector<16x512xbf16>
    %c0_6 = arith.constant 0 : index
    %c0_7 = arith.constant 0 : index
    %9 = vector.load %arg4[%c0_6, %c0_7] : memref<512x256xbf16, #tpu.memory_space<vmem>>, vector<512x256xbf16>
    %cst_8 = arith.constant dense<0.000000e+00> : vector<16x256xf32>
    %10 = tpu.matmul %8, %9, %cst_8 {dimension_numbers = #tpu.dot_dimension_numbers<[1], [0], [0], [1], [0, 0, 1, 1], [], []>} : vector<16x512xbf16>, vector<512x256xbf16>, vector<16x256xf32> -> vector<16x256xf32>
    %c0_9 = arith.constant 0 : index
    %c0_10 = arith.constant 0 : index
    %11 = vector.load %arg5[%c0_9, %c0_10] : memref<1x256xf32, #tpu.memory_space<vmem>>, vector<1x256xf32>
    %12 = vector.broadcast %11 : vector<1x256xf32> to vector<16x256xf32>
    %13 = arith.addf %10, %12 : vector<16x256xf32>
    %cst_11 = arith.constant 0.000000e+00 : f32
    %14 = vector.broadcast %cst_11 : f32 to vector<16x256xf32>
    %15 = arith.maximumf %13, %14 : vector<16x256xf32>
    %16 = arith.truncf %15 : vector<16x256xf32> to vector<16x256xbf16>
    %c0_12 = arith.constant 0 : index
    %c0_13 = arith.constant 0 : index
    %17 = vector.load %arg6[%c0_12, %c0_13] : memref<256x128xbf16, #tpu.memory_space<vmem>>, vector<256x128xbf16>
    %cst_14 = arith.constant dense<0.000000e+00> : vector<16x128xf32>
    %18 = tpu.matmul %16, %17, %cst_14 {dimension_numbers = #tpu.dot_dimension_numbers<[1], [0], [0], [1], [0, 0, 1, 1], [], []>} : vector<16x256xbf16>, vector<256x128xbf16>, vector<16x128xf32> -> vector<16x128xf32>
    %c0_15 = arith.constant 0 : index
    %c0_16 = arith.constant 0 : index
    %19 = vector.load %arg7[%c0_15, %c0_16] : memref<1x128xf32, #tpu.memory_space<vmem>>, vector<1x128xf32>
    %20 = vector.broadcast %19 : vector<1x128xf32> to vector<16x128xf32>
    %21 = arith.addf %18, %20 : vector<16x128xf32>
    %cst_17 = arith.constant 0.000000e+00 : f32
    %22 = vector.broadcast %cst_17 : f32 to vector<16x128xf32>
    %23 = arith.maximumf %21, %22 : vector<16x128xf32>
    %24 = arith.truncf %23 : vector<16x128xf32> to vector<16x128xbf16>
    %c0_18 = arith.constant 0 : index
    %c0_19 = arith.constant 0 : index
    %25 = vector.load %arg8[%c0_18, %c0_19] : memref<128x128xbf16, #tpu.memory_space<vmem>>, vector<128x128xbf16>
    %cst_20 = arith.constant dense<0.000000e+00> : vector<16x128xf32>
    %26 = tpu.matmul %24, %25, %cst_20 {dimension_numbers = #tpu.dot_dimension_numbers<[1], [0], [0], [1], [0, 0, 1, 1], [], []>} : vector<16x128xbf16>, vector<128x128xbf16>, vector<16x128xf32> -> vector<16x128xf32>
    %c0_21 = arith.constant 0 : index
    %c0_22 = arith.constant 0 : index
    %27 = vector.load %arg9[%c0_21, %c0_22] : memref<1x128xf32, #tpu.memory_space<vmem>>, vector<1x128xf32>
    %28 = vector.broadcast %27 : vector<1x128xf32> to vector<16x128xf32>
    %29 = arith.addf %26, %28 : vector<16x128xf32>
    %cst_23 = arith.constant 0.000000e+00 : f32
    %30 = vector.broadcast %cst_23 : f32 to vector<16x128xf32>
    %31 = arith.maximumf %29, %30 : vector<16x128xf32>
    %32 = arith.truncf %31 : vector<16x128xf32> to vector<16x128xbf16>
    %c0_24 = arith.constant 0 : index
    %c0_25 = arith.constant 0 : index
    %33 = vector.load %arg10[%c0_24, %c0_25] : memref<128x128xbf16, #tpu.memory_space<vmem>>, vector<128x128xbf16>
    %cst_26 = arith.constant dense<0.000000e+00> : vector<16x128xf32>
    %34 = tpu.matmul %32, %33, %cst_26 {dimension_numbers = #tpu.dot_dimension_numbers<[1], [0], [0], [1], [0, 0, 1, 1], [], []>} : vector<16x128xbf16>, vector<128x128xbf16>, vector<16x128xf32> -> vector<16x128xf32>
    %c0_27 = arith.constant 0 : index
    %c0_28 = arith.constant 0 : index
    %35 = vector.load %arg11[%c0_27, %c0_28] : memref<1x128xf32, #tpu.memory_space<vmem>>, vector<1x128xf32>
    %36 = vector.broadcast %35 : vector<1x128xf32> to vector<16x128xf32>
    %37 = arith.addf %34, %36 : vector<16x128xf32>
    %cst_29 = arith.constant dense<0xFF800000> : vector<16xf32>
    %38 = vector.multi_reduction <maximumf>, %37, %cst_29 [1] : vector<16x128xf32> to vector<16xf32>
    %39 = vector.shape_cast %38 : vector<16xf32> to vector<16x1xf32>
    %40 = vector.broadcast %39 : vector<16x1xf32> to vector<16x128xf32>
    %41 = arith.subf %37, %40 : vector<16x128xf32>
    %42 = math.exp %41 : vector<16x128xf32>
    %cst_30 = arith.constant dense<0.000000e+00> : vector<16xf32>
    %43 = vector.multi_reduction <add>, %42, %cst_30 [1] : vector<16x128xf32> to vector<16xf32>
    %44 = vector.shape_cast %43 : vector<16xf32> to vector<16x1xf32>
    %45 = math.log %44 : vector<16x1xf32>
    %46 = vector.broadcast %45 : vector<16x1xf32> to vector<16x128xf32>
    %47 = arith.subf %41, %46 : vector<16x128xf32>
    %c0_31 = arith.constant 0 : index
    %c0_32 = arith.constant 0 : index
    %48 = vector.load %arg12[%c0_31, %c0_32] : memref<16x128xf32, #tpu.memory_space<vmem>>, vector<16x128xf32>
    tpu.vector_store %arg12[%c0_31, %c0_32], %47 {strides = array<i32>} : memref<16x128xf32, #tpu.memory_space<vmem>>, vector<16x128xf32>,
    return
  }
  func.func @transform_0(%arg0: i32) -> (i32, i32) {
    %c0_i32 = arith.constant 0 : i32
    %c0_i32_0 = arith.constant 0 : i32
    return %arg0, %c0_i32 : i32, i32
  }
  func.func @transform_1(%arg0: i32) -> (i32, i32) {
    %c0_i32 = arith.constant 0 : i32
    %c0_i32_0 = arith.constant 0 : i32
    %c0_i32_1 = arith.constant 0 : i32
    return %c0_i32, %c0_i32_0 : i32, i32
  }
  func.func @transform_2(%arg0: i32) -> (i32, i32) {
    %c0_i32 = arith.constant 0 : i32
    %c0_i32_0 = arith.constant 0 : i32
    %c0_i32_1 = arith.constant 0 : i32
    return %c0_i32, %c0_i32_0 : i32, i32
  }
  func.func @transform_3(%arg0: i32) -> (i32, i32) {
    %c0_i32 = arith.constant 0 : i32
    %c0_i32_0 = arith.constant 0 : i32
    %c0_i32_1 = arith.constant 0 : i32
    return %c0_i32, %c0_i32_0 : i32, i32
  }
  func.func @transform_4(%arg0: i32) -> (i32, i32) {
    %c0_i32 = arith.constant 0 : i32
    %c0_i32_0 = arith.constant 0 : i32
    %c0_i32_1 = arith.constant 0 : i32
    return %c0_i32, %c0_i32_0 : i32, i32
  }
  func.func @transform_5(%arg0: i32) -> (i32, i32) {
    %c0_i32 = arith.constant 0 : i32
    %c0_i32_0 = arith.constant 0 : i32
    %c0_i32_1 = arith.constant 0 : i32
    return %c0_i32, %c0_i32_0 : i32, i32
  }
  func.func @transform_6(%arg0: i32) -> (i32, i32) {
    %c0_i32 = arith.constant 0 : i32
    %c0_i32_0 = arith.constant 0 : i32
    %c0_i32_1 = arith.constant 0 : i32
    return %c0_i32, %c0_i32_0 : i32, i32
  }
  func.func @transform_7(%arg0: i32) -> (i32, i32) {
    %c0_i32 = arith.constant 0 : i32
    %c0_i32_0 = arith.constant 0 : i32
    %c0_i32_1 = arith.constant 0 : i32
    return %c0_i32, %c0_i32_0 : i32, i32
  }
  func.func @transform_8(%arg0: i32) -> (i32, i32) {
    %c0_i32 = arith.constant 0 : i32
    %c0_i32_0 = arith.constant 0 : i32
    %c0_i32_1 = arith.constant 0 : i32
    return %c0_i32, %c0_i32_0 : i32, i32
  }
  func.func @transform_9(%arg0: i32) -> (i32, i32) {
    %c0_i32 = arith.constant 0 : i32
    %c0_i32_0 = arith.constant 0 : i32
    %c0_i32_1 = arith.constant 0 : i32
    return %c0_i32, %c0_i32_0 : i32, i32
  }
  func.func @transform_10(%arg0: i32) -> (i32, i32) {
    %c0_i32 = arith.constant 0 : i32
    %c0_i32_0 = arith.constant 0 : i32
    %c0_i32_1 = arith.constant 0 : i32
    return %c0_i32, %c0_i32_0 : i32, i32
  }
  func.func @transform_11(%arg0: i32) -> (i32, i32) {
    %c0_i32 = arith.constant 0 : i32
    %c0_i32_0 = arith.constant 0 : i32
    return %arg0, %c0_i32 : i32, i32
  }
}

</mosaic_0001>

<bundles_post_ra>
// kernel: tpu_custom_call.1
= control target key start
LH: loop header
LB: loop body
LE: loop exit
PB: predicated region body
PF: predicated region fallthrough
CT: control target
= control target key end

     0   :  { %16 = vsyncpa [#allocation3], 0  ;;  %s4885_s0 = inlined_call_operand.hbm [shape: bf16[16,896], index: 0, kind: input, shape index: {}]   ;;  %s4886_s1 = inlined_call_operand.hbm [shape: bf16[896,512], index: 1, kind: input, shape index: {}]   ;;  %s4887_s2 = inlined_call_operand.hbm [shape: f32[1,512], index: 2, kind: input, shape index: {}]   ;;  %s4888_s3 = inlined_call_operand.hbm [shape: bf16[512,256], index: 3, kind: input, shape index: {}]   ;;  %s4889_s4 = inlined_call_operand.vmem [shape: f32[1,256], index: 4, kind: input, shape index: {}]   ;;  %s4890_s5 = inlined_call_operand.hbm [shape: bf16[256,128], index: 5, kind: input, shape index: {}]   ;;  %s4891_s6 = inlined_call_operand.vmem [shape: f32[1,128], index: 6, kind: input, shape index: {}]   ;;  %s4892_s7 = inlined_call_operand.hbm [shape: bf16[128,128], index: 7, kind: input, shape index: {}]   ;;  %s4893_s8 = inlined_call_operand.vmem [shape: f32[1,128], index: 8, kind: input, shape index: {}]   ;;  %s4894_s9 = inlined_call_operand.hbm [shape: bf16[128,128], index: 9, kind: input, shape index: {}]   ;;  %s4895_s10 = inlined_call_operand.vmem [shape: f32[1,128], index: 10, kind: input, shape index: {}]   ;;  %s4896_s11 = inlined_call_operand.hbm [shape: f32[16,128], index: 11, kind: output, shape index: {}]  }
   0x1   :  { %17 = vsyncpa [#allocation6], 0 }
   0x2   :  { %18 = vsyncpa [#allocation9], 0 }
   0x3   :  { %19 = vsyncpa [#allocation12], 0  ;;  %s38_s19 = sshll.u32 %s4886_s1, 4  ;;  %s39_s19 = int_to_ptr.hbm [resolvable:$true] %s38_s19 }
   0x4   :  { %20 = vsyncpa [#allocation4], 0  ;;  %s4694_s20 = smov [#allocation5]   ;;  %s62_s24 = sshll.u32 %s4888_s3, 4  ;;  %s63_s24 = int_to_ptr.hbm [resolvable:$true] %s62_s24 }
   0x5   :  { %s40_s21 = sshll.u32 %s4694_s20, 4  ;;  %s4695_s25 = smov 256   ;;  %s41_s21 = int_to_ptr.vmem [resolvable:$true] %s40_s21 }
   0x6   :  { %s4696_s26 = smov 16   ;;  %s4697_s27 = smov [#allocation8]  }
   0x7   :  { %46 = dma.hbm_to_vmem [thread:$0]  %s39_s19, 28672, %s41_s21, [#allocation6], %s4695_s25, %s4695_s25, %s4696_s26  }
   0x8   :  { %s64_s28 = sshll.u32 %s4697_s27, 4  ;;  %s4698_s29 = smov 128   ;;  %s65_s28 = int_to_ptr.vmem [resolvable:$true] %s64_s28 }
   0x9   :  { %s4699_s30 = smov 8   ;;  %s92_s13 = sshll.u32 %s4892_s7, 4  ;;  %s93_s13 = int_to_ptr.hbm [resolvable:$true] %s92_s13 }
   0xa   :  { %70 = dma.hbm_to_vmem [thread:$0]  %s63_s24, 8192, %s65_s28, [#allocation9], %s4698_s29, %s4698_s29, %s4699_s30  }
   0xb   :  { %s4700_s14 = smov [#allocation11]   ;;  %s25_s17 = sshll.u32 %s4885_s0, 4  ;;  %s26_s17 = int_to_ptr.hbm [resolvable:$true] %s25_s17 }
   0xc   :  { %s94_s3 = sshll.u32 %s4700_s14, 4  ;;  %s4701_s18 = smov 64   ;;  %s95_s3 = int_to_ptr.vmem [resolvable:$true] %s94_s3 }
   0xd   :  { %s4702_s19 = smov 4   ;;  %s4703_s20 = smov [#allocation2]  }
   0xe   :  { %100 = dma.hbm_to_vmem [thread:$0]  %s93_s13, 1024, %s95_s3, [#allocation12], %s4701_s18, %s4701_s18, %s4702_s19  }
   0xf   :  { %s27_s21 = sshll.u32 %s4703_s20, 4  ;;  %s4704_s22 = smov 448   ;;  %s28_s21 = int_to_ptr.vmem [resolvable:$true] %s27_s21 }
  0x10   :  { %s4705_s7 = smov 28   ;;  %s52_s25 = sshll.u32 %s4887_s2, 4  ;;  %s53_s25 = int_to_ptr.hbm [resolvable:$true] %s52_s25 }
  0x11   :  { %33 = dma.hbm_to_vmem [thread:$0]  %s26_s17, 896, %s28_s21, [#allocation3], %s4704_s22, %s4704_s22, %s4705_s7  }
  0x12   :  { %s4706_s26 = smov [#allocation7]   ;;  %s77_s1 = sshll.u32 %s4890_s5, 4  ;;  %s78_s1 = int_to_ptr.hbm [resolvable:$true] %s77_s1 }
  0x13   :  { %s54_s0 = sshll.u32 %s4706_s26, 4  ;;  %s4707_s12 = smov [#allocation10]   ;;  %s55_s0 = int_to_ptr.vmem [resolvable:$true] %s54_s0 }
  0x14   :  { %57 = dma.hbm_to_vmem [thread:$0]  %s53_s25, 64, %s55_s0, [#allocation6]  }
  0x15   :  { %s79_s13 = sshll.u32 %s4707_s12, 4  ;;  %s107_s15 = sshll.u32 %s4894_s9, 4  ;;  %s80_s13 = int_to_ptr.vmem [resolvable:$true] %s79_s13  ;;  %s108_s15 = int_to_ptr.hbm [resolvable:$true] %s107_s15 }
  0x16   :  { %85 = dma.hbm_to_vmem [thread:$0]  %s78_s1, 2048, %s80_s13, [#allocation9], %s4701_s18, %s4701_s18, %s4702_s19  }
  0x17   :  { %s4708_s2 = smov [#allocation13]  }
  0x18   :  { %s109_s16 = sshll.u32 %s4708_s2, 4  ;;  %s110_s16 = int_to_ptr.vmem [resolvable:$true] %s109_s16 }
  0x19   :  { %115 = dma.hbm_to_vmem [thread:$0]  %s108_s15, 1024, %s110_s16, [#allocation12], %s4701_s18, %s4701_s18, %s4702_s19  }
  0x1a   :  { %4684 = dma.done.wait [#allocation3], 896  }
  0x1b   :  { %4685 = vsyncadd [#allocation3], 4294966400 }
  0x1c   :  { %4686 = dma.done.wait [#allocation6], 28736  }
  0x1d   :  { %4687 = vsyncadd [#allocation6], 4294938560 }
  0x1e   :  { %4688 = dma.done.wait [#allocation9], 10240  }
  0x1f   :  { %4689 = vsyncadd [#allocation9], 4294957056 }
  0x20   :  { %4690 = dma.done.wait [#allocation12], 2048  }
  0x21   :  { %4691 = vsyncadd [#allocation12], 4294965248  ;;  %v2972_v0 = vld [vmem:[#allocation5 + $0xe0] sm:$0xf]  ;;  %v4175_v1 = vld [vmem:[#allocation5 + $0xec] sm:$0xf0] }
  0x22   :  { %v3100_v2 = vld [vmem:[#allocation5 + $0x1e0] sm:$0xf]  ;;  %v2973_v3 = vor.u32 %v4175_v1, %v2972_v0  ;;  %v4207_v4 = vld [vmem:[#allocation5 + $0x1ec] sm:$0xf0]  ;;  %s2814_s7 = sshll.u32 %s4896_s11, 4  ;;  %s2815_s7 = int_to_ptr.hbm [resolvable:$true] %s2814_s7 }
  0x23   :  { %v3228_v5 = vld [vmem:[#allocation5 + $0x2e0] sm:$0xf]  ;;  %v4239_v6 = vld [vmem:[#allocation5 + $0x2ec] sm:$0xf0]  ;;  %v3101_v7 = vor.u32 %v4207_v4, %v3100_v2 }
  0x24   :  { %v3229_v8 = vor.u32 %v4239_v6, %v3228_v5  ;;  %v3356_v9 = vld [vmem:[#allocation5 + $0x3e0] sm:$0xf]  ;;  %v4271_v10 = vld [vmem:[#allocation5 + $0x3ec] sm:$0xf0]  ;;  %1544 = vmatpush.bf16.msra.mxu0 %v2973_v3 }
  0x25   :  { %v2956_v11 = vld [vmem:[#allocation5 + $0xc0] sm:$0xf]  ;;  %v3357_v12 = vor.u32 %v4271_v10, %v3356_v9  ;;  %v4171_v13 = vld [vmem:[#allocation5 + $0xcc] sm:$0xf0]  ;;  %1558 = vmatpush.bf16.msra.mxu1 %v3101_v7 }
  0x26   :  { %v3084_v14 = vld [vmem:[#allocation5 + $0x1c0] sm:$0xf]  ;;  %v4203_v15 = vld [vmem:[#allocation5 + $0x1cc] sm:$0xf0]  ;;  %1572 = vmatpush.bf16.msra.mxu2 %v3229_v8  ;;  %v2957_v16 = vor.u32 %v4171_v13, %v2956_v11 }
  0x27   :  { %v3085_v17 = vor.u32 %v4203_v15, %v3084_v14  ;;  %v3212_v18 = vld [vmem:[#allocation5 + $0x2c0] sm:$0xf]  ;;  %v4235_v19 = vld [vmem:[#allocation5 + $0x2cc] sm:$0xf0]  ;;  %1586 = vmatpush.bf16.msra.mxu3 %v3357_v12 }
  0x28   :  { %v3340_v20 = vld [vmem:[#allocation5 + $0x3c0] sm:$0xf]  ;;  %v3213_v21 = vor.u32 %v4235_v19, %v3212_v18  ;;  %v4267_v22 = vld [vmem:[#allocation5 + $0x3cc] sm:$0xf0]  ;;  %1545 = vmatpush.bf16.msra.mxu0 %v2957_v16 }
  0x29   :  { %v2940_v23 = vld [vmem:[#allocation5 + $0xa0] sm:$0xf]  ;;  %v4167_v24 = vld [vmem:[#allocation5 + $0xac] sm:$0xf0]  ;;  %v3341_v25 = vor.u32 %v4267_v22, %v3340_v20  ;;  %1559 = vmatpush.bf16.msra.mxu1 %v3085_v17 }
  0x2a   :  { %v3068_v26 = vld [vmem:[#allocation5 + $0x1a0] sm:$0xf]  ;;  %v4199_v27 = vld [vmem:[#allocation5 + $0x1ac] sm:$0xf0]  ;;  %v2941_v29 = vor.u32 %v4167_v24, %v2940_v23  ;;  %1573 = vmatpush.bf16.msra.mxu2 %v3213_v21 }
  0x2b   :  { %v3196_v28 = vld [vmem:[#allocation5 + $0x2a0] sm:$0xf]  ;;  %v4231_v30 = vld [vmem:[#allocation5 + $0x2ac] sm:$0xf0]  ;;  %v3069_v33 = vor.u32 %v4199_v27, %v3068_v26  ;;  %1587 = vmatpush.bf16.msra.mxu3 %v3341_v25 }
  0x2c   :  { %v3324_v31 = vld [vmem:[#allocation5 + $0x3a0] sm:$0xf]  ;;  %v4263_v32 = vld [vmem:[#allocation5 + $0x3ac] sm:$0xf0]  ;;  %v3197_v34 = vor.u32 %v4231_v30, %v3196_v28  ;;  %1546 = vmatpush.bf16.msra.mxu0 %v2941_v29 }
  0x2d   :  { %v2924_v35 = vld [vmem:[#allocation5 + $0x80] sm:$0xf]  ;;  %v4163_v36 = vld [vmem:[#allocation5 + $0x8c] sm:$0xf0]  ;;  %v3325_v38 = vor.u32 %v4263_v32, %v3324_v31  ;;  %1560 = vmatpush.bf16.msra.mxu1 %v3069_v33 }
  0x2e   :  { %v3052_v37 = vld [vmem:[#allocation5 + $0x180] sm:$0xf]  ;;  %v4195_v39 = vld [vmem:[#allocation5 + $0x18c] sm:$0xf0]  ;;  %v2925_v44 = vor.u32 %v4163_v36, %v2924_v35  ;;  %1574 = vmatpush.bf16.msra.mxu2 %v3197_v34 }
  0x2f   :  { %v3180_v40 = vld [vmem:[#allocation5 + $0x280] sm:$0xf]  ;;  %v4227_v41 = vld [vmem:[#allocation5 + $0x28c] sm:$0xf0]  ;;  %v3053_v45 = vor.u32 %v4195_v39, %v3052_v37  ;;  %1588 = vmatpush.bf16.msra.mxu3 %v3325_v38  ;;  %v4173_v37 = vld [vmem:[#allocation5 + $0xe4] sm:$0xf] }
  0x30   :  { %v3308_v42 = vld [vmem:[#allocation5 + $0x380] sm:$0xf]  ;;  %v4259_v43 = vld [vmem:[#allocation5 + $0x38c] sm:$0xf0]  ;;  %v3181_v46 = vor.u32 %v4227_v41, %v3180_v40  ;;  %1547 = vmatpush.bf16.msra.mxu0 %v2925_v44  ;;  %v2974_v38 = vld [vmem:[#allocation5 + $0xf0] sm:$0xf0] }
  0x31   :  { %v2908_v47 = vld [vmem:[#allocation5 + $0x60] sm:$0xf]  ;;  %v4159_v48 = vld [vmem:[#allocation5 + $0x6c] sm:$0xf0]  ;;  %v3309_v50 = vor.u32 %v4259_v43, %v3308_v42  ;;  %1561 = vmatpush.bf16.msra.mxu1 %v3053_v45 }
  0x32   :  { %v3036_v49 = vld [vmem:[#allocation5 + $0x160] sm:$0xf]  ;;  %v4191_v51 = vld [vmem:[#allocation5 + $0x16c] sm:$0xf0]  ;;  %v2909_v56 = vor.u32 %v4159_v48, %v2908_v47  ;;  %1575 = vmatpush.bf16.msra.mxu2 %v3181_v46  ;;  %v2977_v48 = vor.u32 %v4173_v37, %v2974_v38 }
  0x33   :  { %v3164_v52 = vld [vmem:[#allocation5 + $0x260] sm:$0xf]  ;;  %v4223_v53 = vld [vmem:[#allocation5 + $0x26c] sm:$0xf0]  ;;  %v3037_v57 = vor.u32 %v4191_v51, %v3036_v49  ;;  %1589 = vmatpush.bf16.msra.mxu3 %v3309_v50  ;;  %v4169_v50 = vld [vmem:[#allocation5 + $0xc4] sm:$0xf] }
  0x34   :  { %v3292_v54 = vld [vmem:[#allocation5 + $0x360] sm:$0xf]  ;;  %v4255_v55 = vld [vmem:[#allocation5 + $0x36c] sm:$0xf0]  ;;  %v3165_v58 = vor.u32 %v4223_v53, %v3164_v52  ;;  %1548 = vmatpush.bf16.msra.mxu0 %v2909_v56  ;;  %v2958_v51 = vld [vmem:[#allocation5 + $0xd0] sm:$0xf0] }
  0x35   :  { %v2892_v59 = vld [vmem:[#allocation5 + $0x40] sm:$0xf]  ;;  %v4155_v60 = vld [vmem:[#allocation5 + $0x4c] sm:$0xf0]  ;;  %v3293_v62 = vor.u32 %v4255_v55, %v3292_v54  ;;  %1562 = vmatpush.bf16.msra.mxu1 %v3037_v57  ;;  %v2832_v52 = vld [vmem:[#allocation2] sm:$0xf] }
  0x36   :  { %v3020_v61 = vld [vmem:[#allocation5 + $0x140] sm:$0xf]  ;;  %v4187_v63 = vld [vmem:[#allocation5 + $0x14c] sm:$0xf0]  ;;  %v2893_v4 = vor.u32 %v4155_v60, %v2892_v59  ;;  %1576 = vmatpush.bf16.msra.mxu2 %v3165_v58  ;;  %v4141_v53 = vld [vmem:[#allocation2 + $0x18] sm:$0xf0] }
  0x37   :  { %v3148_v0 = vld [vmem:[#allocation5 + $0x240] sm:$0xf]  ;;  %v4219_v1 = vld [vmem:[#allocation5 + $0x24c] sm:$0xf0]  ;;  %v3021_v5 = vor.u32 %v4187_v63, %v3020_v61  ;;  %1590 = vmatpush.bf16.msra.mxu3 %v3293_v62  ;;  %v4803_v57 = vor.u32 %v4141_v53, %v2832_v52  ;;  %v4142_v58 = vld [vmem:[#allocation2 + $0x20] sm:$0xf0] }
  0x38   :  { %v3276_v2 = vld [vmem:[#allocation5 + $0x340] sm:$0xf]  ;;  %v4251_v3 = vld [vmem:[#allocation5 + $0x34c] sm:$0xf0]  ;;  %v3149_v6 = vor.u32 %v4219_v1, %v3148_v0  ;;  %1549 = vmatpush.bf16.msra.mxu0 %v2893_v4  ;;  %v2961_v1 = vor.u32 %v4169_v50, %v2958_v51  ;;  %v4165_v4 = vld [vmem:[#allocation5 + $0xa4] sm:$0xf] }
  0x39   :  { %v2876_v7 = vld [vmem:[#allocation5 + $0x20] sm:$0xf]  ;;  %v4151_v8 = vld [vmem:[#allocation5 + $0x2c] sm:$0xf0]  ;;  %v3277_v10 = vor.u32 %v4251_v3, %v3276_v2  ;;  %1563 = vmatpush.bf16.msra.mxu1 %v3021_v5  ;;  %v2942_v5 = vld [vmem:[#allocation5 + $0xb0] sm:$0xf0] }
  0x3a   :  { %v3004_v9 = vld [vmem:[#allocation5 + $0x120] sm:$0xf]  ;;  %v4183_v11 = vld [vmem:[#allocation5 + $0x12c] sm:$0xf0]  ;;  %v2877_v16 = vor.u32 %v4151_v8, %v2876_v7  ;;  %1577 = vmatpush.bf16.msra.mxu2 %v3149_v6  ;;  %v4138_v6 = vld [vmem:[#allocation2 + $0x4] sm:$0xf] }
  0x3b   :  { %v3132_v12 = vld [vmem:[#allocation5 + $0x220] sm:$0xf]  ;;  %v4215_v13 = vld [vmem:[#allocation5 + $0x22c] sm:$0xf0]  ;;  %v3005_v19 = vor.u32 %v4183_v11, %v3004_v9  ;;  %1591 = vmatpush.bf16.msra.mxu3 %v3277_v10  ;;  %v2834_v7 = vld [vmem:[#allocation2 + $0x1c] sm:$0xf0] }
  0x3c   :  { %v3260_v14 = vld [vmem:[#allocation5 + $0x320] sm:$0xf]  ;;  %v4247_v15 = vld [vmem:[#allocation5 + $0x32c] sm:$0xf0]  ;;  %v3133_v20 = vor.u32 %v4215_v13, %v3132_v12  ;;  %1550 = vmatpush.bf16.msra.mxu0 %v2877_v16  ;;  %v4809_v11 = vor.u32 %v4138_v6, %v2834_v7  ;;  %v4145_v7 = vld [vmem:[#allocation5 + $0x4] sm:$0xf] }
  0x3d   :  { %v2860_v17 = vld [vmem:[#allocation5] sm:$0xf]  ;;  %v4147_v18 = vld [vmem:[#allocation5 + $0xc] sm:$0xf0]  ;;  %v3261_v24 = vor.u32 %v4247_v15, %v3260_v14  ;;  %1564 = vmatpush.bf16.msra.mxu1 %v3005_v19  ;;  %v4139_v19 = vld [vmem:[#allocation2 + $0xc] sm:$0xf] }
  0x3e   :  { %v2988_v21 = vld [vmem:[#allocation5 + $0x100] sm:$0xf]  ;;  %v4179_v22 = vld [vmem:[#allocation5 + $0x10c] sm:$0xf0]  ;;  %v2861_v31 = vor.u32 %v4147_v18, %v2860_v17  ;;  %1578 = vmatpush.bf16.msra.mxu2 %v3133_v20  ;;  %v2945_v17 = vor.u32 %v4165_v4, %v2942_v5 }
  0x3f   :  { %v3116_v23 = vld [vmem:[#allocation5 + $0x200] sm:$0xf]  ;;  %v4211_v25 = vld [vmem:[#allocation5 + $0x20c] sm:$0xf0]  ;;  %v2989_v35 = vor.u32 %v4179_v22, %v2988_v21  ;;  %1592 = vmatpush.bf16.msra.mxu3 %v3261_v24  ;;  %v4161_v21 = vld [vmem:[#allocation5 + $0x84] sm:$0xf] }
  0x40   :  { %v3244_v26 = vld [vmem:[#allocation5 + $0x300] sm:$0xf]  ;;  %v4243_v27 = vld [vmem:[#allocation5 + $0x30c] sm:$0xf0]  ;;  %v3117_v36 = vor.u32 %v4211_v25, %v3116_v23  ;;  %1551 = vmatpush.bf16.msra.mxu0 %v2861_v31  ;;  %v2926_v22 = vld [vmem:[#allocation5 + $0x90] sm:$0xf0] }
  0x41   :  { %v3484_v28 = vld [vmem:[#allocation5 + $0x4e0] sm:$0xf]  ;;  %v4303_v29 = vld [vmem:[#allocation5 + $0x4ec] sm:$0xf0]  ;;  %v3245_v39 = vor.u32 %v4243_v27, %v3244_v26  ;;  %1565 = vmatpush.bf16.msra.mxu1 %v2989_v35  ;;  %v2910_v35 = vld [vmem:[#allocation5 + $0x70] sm:$0xf0] }
  0x42   :  { %v3612_v30 = vld [vmem:[#allocation5 + $0x5e0] sm:$0xf]  ;;  %v4335_v32 = vld [vmem:[#allocation5 + $0x5ec] sm:$0xf0]  ;;  %v3485_v40 = vor.u32 %v4303_v29, %v3484_v28  ;;  %1579 = vmatpush.bf16.msra.mxu2 %v3117_v36 }
  0x43   :  { %v3740_v33 = vld [vmem:[#allocation5 + $0x6e0] sm:$0xf]  ;;  %v4367_v34 = vld [vmem:[#allocation5 + $0x6ec] sm:$0xf0]  ;;  %v3613_v43 = vor.u32 %v4335_v32, %v3612_v30  ;;  %1593 = vmatpush.bf16.msra.mxu3 %v3245_v39  ;;  %1552 = vmatmul.bf16.vlgmr.msra.gmra.mxu0 %v4803_v57  ;;  %v2929_v30 = vor.u32 %v4161_v21, %v2926_v22  ;;  %v2848_v22 = vld [vmem:[#allocation2 + $0x10] sm:$0xf] }
  0x44   :  { %v3468_v41 = vld [vmem:[#allocation5 + $0x4c0] sm:$0xf]  ;;  %v4299_v42 = vld [vmem:[#allocation5 + $0x4cc] sm:$0xf0]  ;;  %v3741_v44 = vor.u32 %v4367_v34, %v3740_v33  ;;  %1600 = vmatpush.bf16.msrb.mxu0 %v3485_v40  ;;  %1566 = vmatmul.bf16.vlgmr.msra.gmra.mxu1 %v4809_v11  ;;  %v4157_v34 = vld [vmem:[#allocation5 + $0x64] sm:$0xf] }
  0x45   :  { %v3596_v45 = vld [vmem:[#allocation5 + $0x5c0] sm:$0xf]  ;;  %v4331_v46 = vld [vmem:[#allocation5 + $0x5cc] sm:$0xf0]  ;;  %v3469_v55 = vor.u32 %v4299_v42, %v3468_v41  ;;  %1614 = vmatpush.bf16.msrb.mxu1 %v3613_v43  ;;  %v2913_v42 = vor.u32 %v4157_v34, %v2910_v35  ;;  %v3086_v34 = vld [vmem:[#allocation5 + $0x1d0] sm:$0xf0] }
  0x46   :  { %v3724_v47 = vld [vmem:[#allocation5 + $0x6c0] sm:$0xf]  ;;  %v4363_v49 = vld [vmem:[#allocation5 + $0x6cc] sm:$0xf0]  ;;  %1628 = vmatpush.bf16.msrb.mxu2 %v3741_v44  ;;  %v3597_v59 = vor.u32 %v4331_v46, %v3596_v45  ;;  %v4153_v46 = vld [vmem:[#allocation5 + $0x44] sm:$0xf] }
  0x47   :  { %v2840_v54 = vld [vmem:[#allocation2 + $0x8] sm:$0xf]  ;;  %v3452_v56 = vld [vmem:[#allocation5 + $0x4a0] sm:$0xf]  ;;  %v3725_v60 = vor.u32 %v4363_v49, %v3724_v47  ;;  %1642 = vmatpush.bf16.msrb.mxu3 %v2977_v48  ;;  %v2894_v47 = vld [vmem:[#allocation5 + $0x50] sm:$0xf0] }
  0x48   :  { %v4295_v61 = vld [vmem:[#allocation5 + $0x4ac] sm:$0xf0]  ;;  %v3580_v62 = vld [vmem:[#allocation5 + $0x5a0] sm:$0xf]  ;;  %v4805_v0 = vor.u32 %v4142_v58, %v2840_v54  ;;  %1601 = vmatpush.bf16.msrb.mxu0 %v3469_v55  ;;  %v2897_v54 = vor.u32 %v4153_v46, %v2894_v47  ;;  %v4233_v35 = vld [vmem:[#allocation5 + $0x2c4] sm:$0xf] }
  0x49   :  { %v4327_v63 = vld [vmem:[#allocation5 + $0x5ac] sm:$0xf0]  ;;  %v3708_v2 = vld [vmem:[#allocation5 + $0x6a0] sm:$0xf]  ;;  %v3453_v8 = vor.u32 %v4295_v61, %v3452_v56  ;;  %1615 = vmatpush.bf16.msrb.mxu1 %v3597_v59  ;;  %v4149_v59 = vld [vmem:[#allocation5 + $0x24] sm:$0xf] }
  0x4a   :  { %v4359_v3 = vld [vmem:[#allocation5 + $0x6ac] sm:$0xf0]  ;;  %1580 = vmatmul.bf16.vlgmr.msra.gmra.mxu2 %v4805_v0  ;;  %v3436_v9 = vld [vmem:[#allocation5 + $0x480] sm:$0xf]  ;;  %v3581_v12 = vor.u32 %v4327_v63, %v3580_v62 }
  0x4b   :  { %v4291_v10 = vld [vmem:[#allocation5 + $0x48c] sm:$0xf0]  ;;  %1629 = vmatpush.bf16.msrb.mxu2 %v3725_v60  ;;  %v3709_v13 = vor.u32 %v4359_v3, %v3708_v2  ;;  %v3564_v14 = vld [vmem:[#allocation5 + $0x580] sm:$0xf]  ;;  %1643 = vmatpush.bf16.msrb.mxu3 %v2961_v1  ;;  %v2878_v60 = vld [vmem:[#allocation5 + $0x30] sm:$0xf0] }
  0x4c   :  { %v4323_v15 = vld [vmem:[#allocation5 + $0x58c] sm:$0xf0]  ;;  %v3692_v16 = vld [vmem:[#allocation5 + $0x680] sm:$0xf]  ;;  %1602 = vmatpush.bf16.msrb.mxu0 %v3453_v8  ;;  %v3437_v24 = vor.u32 %v4291_v10, %v3436_v9  ;;  %v2881_v8 = vor.u32 %v4149_v59, %v2878_v60  ;;  %v2862_v9 = vld [vmem:[#allocation5 + $0x10] sm:$0xf0] }
  0x4d   :  { %v4355_v18 = vld [vmem:[#allocation5 + $0x68c] sm:$0xf0]  ;;  %1616 = vmatpush.bf16.msrb.mxu1 %v3581_v12  ;;  %v3565_v25 = vor.u32 %v4323_v15, %v3564_v14  ;;  %v3420_v27 = vld [vmem:[#allocation5 + $0x460] sm:$0xf]  ;;  %v4205_v10 = vld [vmem:[#allocation5 + $0x1e4] sm:$0xf] }
  0x4e   :  { %v2842_v20 = vld [vmem:[#allocation2 + $0x24] sm:$0xf0]  ;;  %v3693_v26 = vor.u32 %v4355_v18, %v3692_v16  ;;  %v3548_v29 = vld [vmem:[#allocation5 + $0x560] sm:$0xf]  ;;  %v3102_v12 = vld [vmem:[#allocation5 + $0x1f0] sm:$0xf0] }
  0x4f   :  { %v4812_v23 = vor.u32 %v4139_v19, %v2842_v20  ;;  %1630 = vmatpush.bf16.msrb.mxu2 %v3709_v13  ;;  %v4287_v28 = vld [vmem:[#allocation5 + $0x46c] sm:$0xf0]  ;;  %1644 = vmatpush.bf16.msrb.mxu3 %v2945_v17  ;;  %v3676_v32 = vld [vmem:[#allocation5 + $0x660] sm:$0xf]  ;;  %v4237_v13 = vld [vmem:[#allocation5 + $0x2e4] sm:$0xf] }
  0x50   :  { %v4319_v31 = vld [vmem:[#allocation5 + $0x56c] sm:$0xf0]  ;;  %1603 = vmatpush.bf16.msrb.mxu0 %v3437_v24  ;;  %v3421_v36 = vor.u32 %v4287_v28, %v3420_v27  ;;  %v3404_v39 = vld [vmem:[#allocation5 + $0x440] sm:$0xf]  ;;  %v3230_v14 = vld [vmem:[#allocation5 + $0x2f0] sm:$0xf0]  ;;  %v3105_v27 = vor.u32 %v4205_v10, %v3102_v12 }
  0x51   :  { %v4351_v33 = vld [vmem:[#allocation5 + $0x66c] sm:$0xf0]  ;;  %1594 = vmatmul.bf16.vlgmr.msra.gmra.mxu3 %v4812_v23  ;;  %1617 = vmatpush.bf16.msrb.mxu1 %v3565_v25  ;;  %v3549_v37 = vor.u32 %v4319_v31, %v3548_v29  ;;  %v3532_v41 = vld [vmem:[#allocation5 + $0x540] sm:$0xf]  ;;  %v4269_v15 = vld [vmem:[#allocation5 + $0x3e4] sm:$0xf]  ;;  %v3233_v31 = vor.u32 %v4237_v13, %v3230_v14 }
  0x52   :  { %v3677_v38 = vor.u32 %v4351_v33, %v3676_v32  ;;  %v4283_v40 = vld [vmem:[#allocation5 + $0x44c] sm:$0xf0]  ;;  %v3660_v44 = vld [vmem:[#allocation5 + $0x640] sm:$0xf]  ;;  %v3358_v17 = vld [vmem:[#allocation5 + $0x3f0] sm:$0xf0] }
  0x53   :  { %1631 = vmatpush.bf16.msrb.mxu2 %v3693_v26  ;;  %1645 = vmatpush.bf16.msrb.mxu3 %v2929_v30  ;;  %v4315_v43 = vld [vmem:[#allocation5 + $0x54c] sm:$0xf0]  ;;  %v3405_v48 = vor.u32 %v4283_v40, %v3404_v39  ;;  %v3388_v51 = vld [vmem:[#allocation5 + $0x420] sm:$0xf]  ;;  %v4301_v18 = vld [vmem:[#allocation5 + $0x4e4] sm:$0xf]  ;;  %v2865_v26 = vor.u32 %v4145_v7, %v2862_v9  ;;  %v3361_v32 = vor.u32 %v4269_v15, %v3358_v17 }
  0x54   :  { %v4347_v45 = vld [vmem:[#allocation5 + $0x64c] sm:$0xf0]  ;;  %1604 = vmatpush.bf16.msrb.mxu0 %v3421_v36  ;;  %v3533_v49 = vor.u32 %v4315_v43, %v3532_v41  ;;  %v3516_v53 = vld [vmem:[#allocation5 + $0x520] sm:$0xf]  ;;  %v3486_v19 = vld [vmem:[#allocation5 + $0x4f0] sm:$0xf0] }
  0x55   :  { %1618 = vmatpush.bf16.msrb.mxu1 %v3549_v37  ;;  %v3661_v50 = vor.u32 %v4347_v45, %v3660_v44  ;;  %v4279_v52 = vld [vmem:[#allocation5 + $0x42c] sm:$0xf0]  ;;  %v3644_v56 = vld [vmem:[#allocation5 + $0x620] sm:$0xf]  ;;  %v4143_v24 = vld [vmem:[#allocation2 + $0x28] sm:$0xf0]  ;;  %v3489_v36 = vor.u32 %v4301_v18, %v3486_v19 }
  0x56   :  { %v4311_v55 = vld [vmem:[#allocation5 + $0x52c] sm:$0xf0]  ;;  %v3372_v61 = vld [vmem:[#allocation5 + $0x400] sm:$0xf]  ;;  %v3389_v62 = vor.u32 %v4279_v52, %v3388_v51  ;;  %v4144_v28 = vld [vmem:[#allocation2 + $0x30] sm:$0xf0]  ;;  %v4815_v37 = vor.u32 %v4143_v24, %v2848_v22 }
  0x57   :  { %1632 = vmatpush.bf16.msrb.mxu2 %v3677_v38  ;;  %1646 = vmatpush.bf16.msrb.mxu3 %v2913_v42  ;;  %v4343_v58 = vld [vmem:[#allocation5 + $0x62c] sm:$0xf0]  ;;  %v3500_v1 = vld [vmem:[#allocation5 + $0x500] sm:$0xf]  ;;  %v3517_v3 = vor.u32 %v4311_v55, %v3516_v53  ;;  %v4140_v29 = vld [vmem:[#allocation2 + $0x14] sm:$0xf] }
  0x58   :  { %1605 = vmatpush.bf16.msrb.mxu0 %v3405_v48  ;;  %v4275_v63 = vld [vmem:[#allocation5 + $0x40c] sm:$0xf0]  ;;  %v3645_v4 = vor.u32 %v4343_v58, %v3644_v56  ;;  %v3628_v5 = vld [vmem:[#allocation5 + $0x600] sm:$0xf]  ;;  %v2850_v30 = vld [vmem:[#allocation2 + $0x2c] sm:$0xf0] }
  0x59   :  { %v4307_v2 = vld [vmem:[#allocation5 + $0x50c] sm:$0xf0]  ;;  %1619 = vmatpush.bf16.msrb.mxu1 %v3533_v49  ;;  %v3373_v16 = vor.u32 %v4275_v63, %v3372_v61  ;;  %v2856_v25 = vld [vmem:[#allocation2 + $0x18] sm:$0xf]  ;;  %v4201_v33 = vld [vmem:[#allocation5 + $0x1c4] sm:$0xf]  ;;  %v4819_v42 = vor.u32 %v4140_v29, %v2850_v30 }
  0x5a   :  { %v4339_v6 = vld [vmem:[#allocation5 + $0x60c] sm:$0xf0]  ;;  %v3501_v20 = vor.u32 %v4307_v2, %v3500_v1  ;;  %v3214_v38 = vld [vmem:[#allocation5 + $0x2d0] sm:$0xf0]  ;;  %v4265_v39 = vld [vmem:[#allocation5 + $0x3c4] sm:$0xf]  ;;  %v4817_v41 = vor.u32 %v4144_v28, %v2856_v25  ;;  %v3089_v45 = vor.u32 %v4201_v33, %v3086_v34 }
  0x5b   :  { %1633 = vmatpush.bf16.msrb.mxu2 %v3661_v50  ;;  %1647 = vmatpush.bf16.msrb.mxu3 %v2897_v54  ;;  %v3629_v21 = vor.u32 %v4339_v6, %v3628_v5  ;;  %v3342_v40 = vld [vmem:[#allocation5 + $0x3d0] sm:$0xf0]  ;;  %v4297_v43 = vld [vmem:[#allocation5 + $0x4c4] sm:$0xf]  ;;  %v3217_v46 = vor.u32 %v4233_v35, %v3214_v38 }
  0x5c   :  { %1606 = vmatpush.bf16.msrb.mxu0 %v3389_v62  ;;  %v3470_v44 = vld [vmem:[#allocation5 + $0x4d0] sm:$0xf0]  ;;  %v3345_v47 = vor.u32 %v4265_v39, %v3342_v40  ;;  %v4197_v48 = vld [vmem:[#allocation5 + $0x1a4] sm:$0xf] }
  0x5d   :  { %1620 = vmatpush.bf16.msrb.mxu1 %v3517_v3  ;;  %v3070_v49 = vld [vmem:[#allocation5 + $0x1b0] sm:$0xf0]  ;;  %v4229_v50 = vld [vmem:[#allocation5 + $0x2a4] sm:$0xf]  ;;  %v3473_v51 = vor.u32 %v4297_v43, %v3470_v44 }
  0x5e   :  { %v3198_v52 = vld [vmem:[#allocation5 + $0x2b0] sm:$0xf0]  ;;  %v4261_v53 = vld [vmem:[#allocation5 + $0x3a4] sm:$0xf]  ;;  %v3073_v58 = vor.u32 %v4197_v48, %v3070_v49 }
  0x5f   :  { %1634 = vmatpush.bf16.msrb.mxu2 %v3645_v4  ;;  %1648 = vmatpush.bf16.msrb.mxu3 %v2881_v8  ;;  %v3326_v54 = vld [vmem:[#allocation5 + $0x3b0] sm:$0xf0]  ;;  %v4293_v55 = vld [vmem:[#allocation5 + $0x4a4] sm:$0xf]  ;;  %v3201_v59 = vor.u32 %v4229_v50, %v3198_v52 }
  0x60   :  { %1607 = vmatpush.bf16.msrb.mxu0 %v3373_v16  ;;  %v3454_v56 = vld [vmem:[#allocation5 + $0x4b0] sm:$0xf0]  ;;  %v3329_v60 = vor.u32 %v4261_v53, %v3326_v54  ;;  %v4193_v61 = vld [vmem:[#allocation5 + $0x184] sm:$0xf] }
  0x61   :  { %1621 = vmatpush.bf16.msrb.mxu1 %v3501_v20  ;;  %v3054_v62 = vld [vmem:[#allocation5 + $0x190] sm:$0xf0]  ;;  %v4225_v63 = vld [vmem:[#allocation5 + $0x284] sm:$0xf]  ;;  %v3457_v1 = vor.u32 %v4293_v55, %v3454_v56 }
  0x62   :  { %v3182_v2 = vld [vmem:[#allocation5 + $0x290] sm:$0xf0]  ;;  %v4257_v3 = vld [vmem:[#allocation5 + $0x384] sm:$0xf]  ;;  %v3057_v7 = vor.u32 %v4193_v61, %v3054_v62 }
  0x63   :  { %1635 = vmatpush.bf16.msrb.mxu2 %v3629_v21  ;;  %1649 = vmatpush.bf16.msrb.mxu3 %v2865_v26  ;;  %v3310_v4 = vld [vmem:[#allocation5 + $0x390] sm:$0xf0]  ;;  %v4289_v5 = vld [vmem:[#allocation5 + $0x484] sm:$0xf]  ;;  %v3185_v8 = vor.u32 %v4225_v63, %v3182_v2 }
  0x64   :  { %1656 = vmatpush.bf16.msra.mxu0 %v3105_v27  ;;  %1622 = vmatmul.bf16.vlgmr.msrb.gmra.mxu1 %v4819_v42  ;;  %v3438_v6 = vld [vmem:[#allocation5 + $0x490] sm:$0xf0]  ;;  %v3313_v9 = vor.u32 %v4257_v3, %v3310_v4  ;;  %v4189_v10 = vld [vmem:[#allocation5 + $0x164] sm:$0xf]  ;;  %v2980_v3 = vld [vmem:[#allocation5 + $0xe8] sm:$0xf] }
  0x65   :  { %1670 = vmatpush.bf16.msra.mxu1 %v3233_v31  ;;  %1608 = vmatmul.bf16.vlgmr.msrb.gmra.mxu0 %v4815_v37  ;;  %v3038_v12 = vld [vmem:[#allocation5 + $0x170] sm:$0xf0]  ;;  %v4221_v13 = vld [vmem:[#allocation5 + $0x264] sm:$0xf]  ;;  %v3441_v14 = vor.u32 %v4289_v5, %v3438_v6  ;;  %v4176_v4 = vld [vmem:[#allocation5 + $0xf4] sm:$0xf0] }
  0x66   :  { %1636 = vmatmul.bf16.vlgmr.msrb.gmra.mxu2 %v4817_v41  ;;  %1650 = vmatmul.bf16.vlgmr.msrb.gmra.mxu3 %v4803_v57  ;;  %v3166_v15 = vld [vmem:[#allocation5 + $0x270] sm:$0xf0]  ;;  %v4253_v16 = vld [vmem:[#allocation5 + $0x364] sm:$0xf]  ;;  %v3041_v20 = vor.u32 %v4189_v10, %v3038_v12 }
  0x67   :  { %1684 = vmatpush.bf16.msra.mxu2 %v3361_v32  ;;  %1698 = vmatpush.bf16.msra.mxu3 %v3489_v36  ;;  %v3294_v17 = vld [vmem:[#allocation5 + $0x370] sm:$0xf0]  ;;  %v4285_v18 = vld [vmem:[#allocation5 + $0x464] sm:$0xf]  ;;  %v3169_v21 = vor.u32 %v4221_v13, %v3166_v15  ;;  %v2981_v13 = vor.u32 %v4176_v4, %v2980_v3 }
  0x68   :  { %1657 = vmatpush.bf16.msra.mxu0 %v3089_v45  ;;  %v3422_v19 = vld [vmem:[#allocation5 + $0x470] sm:$0xf0]  ;;  %v3297_v22 = vor.u32 %v4253_v16, %v3294_v17  ;;  %v4185_v24 = vld [vmem:[#allocation5 + $0x144] sm:$0xf] }
  0x69   :  { %1671 = vmatpush.bf16.msra.mxu1 %v3217_v46  ;;  %v3022_v25 = vld [vmem:[#allocation5 + $0x150] sm:$0xf0]  ;;  %v4217_v26 = vld [vmem:[#allocation5 + $0x244] sm:$0xf]  ;;  %v3425_v27 = vor.u32 %v4285_v18, %v3422_v19  ;;  %v2964_v19 = vld [vmem:[#allocation5 + $0xc8] sm:$0xf] }
  0x6a   :  { %v3150_v28 = vld [vmem:[#allocation5 + $0x250] sm:$0xf0]  ;;  %v4249_v29 = vld [vmem:[#allocation5 + $0x344] sm:$0xf]  ;;  %v3025_v33 = vor.u32 %v4185_v24, %v3022_v25 }
  0x6b   :  { %1685 = vmatpush.bf16.msra.mxu2 %v3345_v47  ;;  %1699 = vmatpush.bf16.msra.mxu3 %v3473_v51  ;;  %v3278_v30 = vld [vmem:[#allocation5 + $0x350] sm:$0xf0]  ;;  %v4281_v31 = vld [vmem:[#allocation5 + $0x444] sm:$0xf]  ;;  %v3153_v34 = vor.u32 %v4217_v26, %v3150_v28 }
  0x6c   :  { %1658 = vmatpush.bf16.msra.mxu0 %v3073_v58  ;;  %v3406_v32 = vld [vmem:[#allocation5 + $0x450] sm:$0xf0]  ;;  %v3281_v35 = vor.u32 %v4249_v29, %v3278_v30  ;;  %v4181_v36 = vld [vmem:[#allocation5 + $0x124] sm:$0xf] }
  0x6d   :  { %1672 = vmatpush.bf16.msra.mxu1 %v3201_v59  ;;  %v3006_v38 = vld [vmem:[#allocation5 + $0x130] sm:$0xf0]  ;;  %v4213_v39 = vld [vmem:[#allocation5 + $0x224] sm:$0xf]  ;;  %v3409_v40 = vor.u32 %v4281_v31, %v3406_v32  ;;  %v2948_v32 = vld [vmem:[#allocation5 + $0xa8] sm:$0xf] }
  0x6e   :  { %v3134_v43 = vld [vmem:[#allocation5 + $0x230] sm:$0xf0]  ;;  %v4245_v44 = vld [vmem:[#allocation5 + $0x324] sm:$0xf]  ;;  %v3009_v48 = vor.u32 %v4181_v36, %v3006_v38 }
  0x6f   :  { %1686 = vmatpush.bf16.msra.mxu2 %v3329_v60  ;;  %1700 = vmatpush.bf16.msra.mxu3 %v3457_v1  ;;  %v3262_v45 = vld [vmem:[#allocation5 + $0x330] sm:$0xf0]  ;;  %v4277_v46 = vld [vmem:[#allocation5 + $0x424] sm:$0xf]  ;;  %v3137_v51 = vor.u32 %v4213_v39, %v3134_v43 }
  0x70   :  { %1659 = vmatpush.bf16.msra.mxu0 %v3057_v7  ;;  %v3390_v47 = vld [vmem:[#allocation5 + $0x430] sm:$0xf0]  ;;  %v4177_v49 = vld [vmem:[#allocation5 + $0x104] sm:$0xf]  ;;  %v3265_v52 = vor.u32 %v4245_v44, %v3262_v45  ;;  %v3108_v7 = vld [vmem:[#allocation5 + $0x1e8] sm:$0xf] }
  0x71   :  { %1673 = vmatpush.bf16.msra.mxu1 %v3185_v8  ;;  %v2990_v50 = vld [vmem:[#allocation5 + $0x110] sm:$0xf0]  ;;  %v4209_v53 = vld [vmem:[#allocation5 + $0x204] sm:$0xf]  ;;  %v3393_v56 = vor.u32 %v4277_v46, %v3390_v47  ;;  %v4208_v8 = vld [vmem:[#allocation5 + $0x1f4] sm:$0xf0] }
  0x72   :  { %v3118_v54 = vld [vmem:[#allocation5 + $0x210] sm:$0xf0]  ;;  %v4241_v55 = vld [vmem:[#allocation5 + $0x304] sm:$0xf]  ;;  %v2993_v1 = vor.u32 %v4177_v49, %v2990_v50  ;;  %v3109_v17 = vor.u32 %v4208_v8, %v3108_v7  ;;  %v2932_v47 = vld [vmem:[#allocation5 + $0x88] sm:$0xf] }
  0x73   :  { %1687 = vmatpush.bf16.msra.mxu2 %v3313_v9  ;;  %1701 = vmatpush.bf16.msra.mxu3 %v3441_v14  ;;  %v3246_v58 = vld [vmem:[#allocation5 + $0x310] sm:$0xf0]  ;;  %v4273_v59 = vld [vmem:[#allocation5 + $0x404] sm:$0xf]  ;;  %v3121_v5 = vor.u32 %v4209_v53, %v3118_v54  ;;  %v3060_v49 = vld [vmem:[#allocation5 + $0x188] sm:$0xf] }
  0x74   :  { %1660 = vmatpush.bf16.msra.mxu0 %v3041_v20  ;;  %v3374_v60 = vld [vmem:[#allocation5 + $0x410] sm:$0xf0]  ;;  %v4333_v61 = vld [vmem:[#allocation5 + $0x5e4] sm:$0xf]  ;;  %v3249_v6 = vor.u32 %v4241_v55, %v3246_v58  ;;  %v4172_v20 = vld [vmem:[#allocation5 + $0xd4] sm:$0xf0] }
  0x75   :  { %1674 = vmatpush.bf16.msra.mxu1 %v3169_v21  ;;  %v3614_v62 = vld [vmem:[#allocation5 + $0x5f0] sm:$0xf0]  ;;  %v4365_v63 = vld [vmem:[#allocation5 + $0x6e4] sm:$0xf]  ;;  %v3377_v9 = vor.u32 %v4273_v59, %v3374_v60  ;;  %v3092_v21 = vld [vmem:[#allocation5 + $0x1c8] sm:$0xf]  ;;  %v2965_v26 = vor.u32 %v4172_v20, %v2964_v19 }
  0x76   :  { %v3742_v2 = vld [vmem:[#allocation5 + $0x6f0] sm:$0xf0]  ;;  %v3617_v10 = vor.u32 %v4333_v61, %v3614_v62  ;;  %v4329_v14 = vld [vmem:[#allocation5 + $0x5c4] sm:$0xf]  ;;  %v4196_v50 = vld [vmem:[#allocation5 + $0x194] sm:$0xf0] }
  0x77   :  { %1688 = vmatpush.bf16.msra.mxu2 %v3297_v22  ;;  %1702 = vmatpush.bf16.msra.mxu3 %v3425_v27  ;;  %v3745_v12 = vor.u32 %v4365_v63, %v3742_v2  ;;  %v3598_v15 = vld [vmem:[#allocation5 + $0x5d0] sm:$0xf0]  ;;  %v4361_v16 = vld [vmem:[#allocation5 + $0x6c4] sm:$0xf]  ;;  %v4204_v22 = vld [vmem:[#allocation5 + $0x1d4] sm:$0xf0]  ;;  %v3061_v58 = vor.u32 %v4196_v50, %v3060_v49 }
  0x78   :  { %1661 = vmatpush.bf16.msra.mxu0 %v3025_v33  ;;  %v3726_v18 = vld [vmem:[#allocation5 + $0x6d0] sm:$0xf0]  ;;  %v3601_v24 = vor.u32 %v4329_v14, %v3598_v15  ;;  %v4325_v27 = vld [vmem:[#allocation5 + $0x5a4] sm:$0xf]  ;;  %v3093_v30 = vor.u32 %v4204_v22, %v3092_v21  ;;  %v4168_v33 = vld [vmem:[#allocation5 + $0xb4] sm:$0xf0] }
  0x79   :  { %1675 = vmatpush.bf16.msra.mxu1 %v3153_v34  ;;  %v3729_v25 = vor.u32 %v4361_v16, %v3726_v18  ;;  %v3582_v28 = vld [vmem:[#allocation5 + $0x5b0] sm:$0xf0]  ;;  %v4357_v29 = vld [vmem:[#allocation5 + $0x6a4] sm:$0xf]  ;;  %v3076_v34 = vld [vmem:[#allocation5 + $0x1a8] sm:$0xf]  ;;  %v2949_v39 = vor.u32 %v4168_v33, %v2948_v32 }
  0x7a   :  { %v3710_v31 = vld [vmem:[#allocation5 + $0x6b0] sm:$0xf0]  ;;  %v3585_v36 = vor.u32 %v4325_v27, %v3582_v28  ;;  %v4353_v44 = vld [vmem:[#allocation5 + $0x684] sm:$0xf]  ;;  %v2916_v60 = vld [vmem:[#allocation5 + $0x68] sm:$0xf] }
  0x7b   :  { %1689 = vmatpush.bf16.msra.mxu2 %v3281_v35  ;;  %1703 = vmatpush.bf16.msra.mxu3 %v3409_v40  ;;  %v4200_v35 = vld [vmem:[#allocation5 + $0x1b4] sm:$0xf0]  ;;  %v3713_v38 = vor.u32 %v4357_v29, %v3710_v31  ;;  %v4321_v40 = vld [vmem:[#allocation5 + $0x584] sm:$0xf]  ;;  %v3566_v43 = vld [vmem:[#allocation5 + $0x590] sm:$0xf0] }
  0x7c   :  { %1662 = vmatpush.bf16.msra.mxu0 %v3009_v48  ;;  %v3077_v45 = vor.u32 %v4200_v35, %v3076_v34  ;;  %v3694_v46 = vld [vmem:[#allocation5 + $0x690] sm:$0xf0]  ;;  %v4164_v48 = vld [vmem:[#allocation5 + $0x94] sm:$0xf0]  ;;  %v4317_v54 = vld [vmem:[#allocation5 + $0x564] sm:$0xf] }
  0x7d   :  { %1676 = vmatpush.bf16.msra.mxu1 %v3137_v51  ;;  %v3569_v51 = vor.u32 %v4321_v40, %v3566_v43  ;;  %v2933_v53 = vor.u32 %v4164_v48, %v2932_v47  ;;  %v3550_v55 = vld [vmem:[#allocation5 + $0x570] sm:$0xf0]  ;;  %v4160_v61 = vld [vmem:[#allocation5 + $0x74] sm:$0xf0]  ;;  %v3044_v62 = vld [vmem:[#allocation5 + $0x168] sm:$0xf] }
  0x7e   :  { %v3678_v59 = vld [vmem:[#allocation5 + $0x670] sm:$0xf0]  ;;  %v4192_v63 = vld [vmem:[#allocation5 + $0x174] sm:$0xf0]  ;;  %v2917_v3 = vor.u32 %v4160_v61, %v2916_v60  ;;  %v4313_v4 = vld [vmem:[#allocation5 + $0x544] sm:$0xf] }
  0x7f   :  { %1690 = vmatpush.bf16.msra.mxu2 %v3265_v52  ;;  %1704 = vmatpush.bf16.msra.mxu3 %v3393_v56  ;;  %v3697_v52 = vor.u32 %v4353_v44, %v3694_v46  ;;  %v4349_v56 = vld [vmem:[#allocation5 + $0x664] sm:$0xf]  ;;  %v3045_v7 = vor.u32 %v4192_v63, %v3044_v62  ;;  %v3662_v8 = vld [vmem:[#allocation5 + $0x650] sm:$0xf0]  ;;  %v2884_v22 = vld [vmem:[#allocation5 + $0x28] sm:$0xf] }
  0x80   :  { %1663 = vmatpush.bf16.msra.mxu0 %v2993_v1  ;;  %v3553_v1 = vor.u32 %v4317_v54, %v3550_v55  ;;  %v3681_v2 = vor.u32 %v4349_v56, %v3678_v59  ;;  %v3518_v18 = vld [vmem:[#allocation5 + $0x530] sm:$0xf0]  ;;  %v4341_v19 = vld [vmem:[#allocation5 + $0x624] sm:$0xf]  ;;  %v2868_v34 = vld [vmem:[#allocation5 + $0x8] sm:$0xf] }
  0x81   :  { %1677 = vmatpush.bf16.msra.mxu1 %v3121_v5  ;;  %v3534_v5 = vld [vmem:[#allocation5 + $0x550] sm:$0xf0]  ;;  %v4305_v28 = vld [vmem:[#allocation5 + $0x504] sm:$0xf]  ;;  %v3236_v40 = vld [vmem:[#allocation5 + $0x2e8] sm:$0xf] }
  0x82   :  { %v3537_v14 = vor.u32 %v4313_v4, %v3534_v5  ;;  %v3646_v21 = vld [vmem:[#allocation5 + $0x630] sm:$0xf0]  ;;  %v4337_v32 = vld [vmem:[#allocation5 + $0x604] sm:$0xf]  ;;  %v4240_v43 = vld [vmem:[#allocation5 + $0x2f4] sm:$0xf0] }
  0x83   :  { %1691 = vmatpush.bf16.msra.mxu2 %v3249_v6  ;;  %1705 = vmatpush.bf16.msra.mxu3 %v3377_v9  ;;  %v4345_v6 = vld [vmem:[#allocation5 + $0x644] sm:$0xf]  ;;  %v2900_v9 = vld [vmem:[#allocation5 + $0x48] sm:$0xf]  ;;  %v3502_v29 = vld [vmem:[#allocation5 + $0x510] sm:$0xf0]  ;;  %v3237_v54 = vor.u32 %v4240_v43, %v3236_v40 }
  0x84   :  { %1712 = vmatpush.bf16.msrb.mxu0 %v3617_v10  ;;  %1678 = vmatmul.bf16.vlgmr.msra.gmra.mxu1 %v4805_v0  ;;  %v4156_v10 = vld [vmem:[#allocation5 + $0x54] sm:$0xf0]  ;;  %v3665_v15 = vor.u32 %v4345_v6, %v3662_v8  ;;  %v3630_v33 = vld [vmem:[#allocation5 + $0x610] sm:$0xf0]  ;;  %v3364_v44 = vld [vmem:[#allocation5 + $0x3e8] sm:$0xf] }
  0x85   :  { %1726 = vmatpush.bf16.msrb.mxu1 %v3745_v12  ;;  %1664 = vmatmul.bf16.vlgmr.msra.gmra.mxu0 %v4809_v11  ;;  %v3028_v12 = vld [vmem:[#allocation5 + $0x148] sm:$0xf]  ;;  %v2901_v16 = vor.u32 %v4156_v10, %v2900_v9  ;;  %v4272_v46 = vld [vmem:[#allocation5 + $0x3f4] sm:$0xf0]  ;;  %v3633_v49 = vor.u32 %v4337_v32, %v3630_v33 }
  0x86   :  { %1692 = vmatmul.bf16.vlgmr.msra.gmra.mxu2 %v4812_v23  ;;  %1706 = vmatmul.bf16.vlgmr.msra.gmra.mxu3 %v4815_v37  ;;  %v3492_v47 = vld [vmem:[#allocation5 + $0x4e8] sm:$0xf]  ;;  %v4304_v48 = vld [vmem:[#allocation5 + $0x4f4] sm:$0xf0]  ;;  %v3365_v55 = vor.u32 %v4272_v46, %v3364_v44 }
  0x87   :  { %1740 = vmatpush.bf16.msrb.mxu2 %v2981_v13  ;;  %1754 = vmatpush.bf16.msrb.mxu3 %v3109_v17  ;;  %v4188_v13 = vld [vmem:[#allocation5 + $0x154] sm:$0xf0]  ;;  %v4309_v17 = vld [vmem:[#allocation5 + $0x524] sm:$0xf]  ;;  %v3493_v56 = vor.u32 %v4304_v48, %v3492_v47  ;;  %v3348_v60 = vld [vmem:[#allocation5 + $0x3c8] sm:$0xf] }
  0x88   :  { %1713 = vmatpush.bf16.msrb.mxu0 %v3601_v24  ;;  %v3029_v20 = vor.u32 %v4188_v13, %v3028_v12  ;;  %v4152_v24 = vld [vmem:[#allocation5 + $0x34] sm:$0xf0]  ;;  %v3521_v27 = vor.u32 %v4309_v17, %v3518_v18  ;;  %v3476_v63 = vld [vmem:[#allocation5 + $0x4c8] sm:$0xf] }
  0x89   :  { %1727 = vmatpush.bf16.msrb.mxu1 %v3729_v25  ;;  %v3012_v25 = vld [vmem:[#allocation5 + $0x128] sm:$0xf]  ;;  %v2885_v31 = vor.u32 %v4152_v24, %v2884_v22  ;;  %v4236_v59 = vld [vmem:[#allocation5 + $0x2d4] sm:$0xf0] }
  0x8a   :  { %v4268_v62 = vld [vmem:[#allocation5 + $0x3d4] sm:$0xf0]  ;;  %v3332_v9 = vld [vmem:[#allocation5 + $0x3a8] sm:$0xf] }
  0x8b   :  { %1741 = vmatpush.bf16.msrb.mxu2 %v2965_v26  ;;  %1755 = vmatpush.bf16.msrb.mxu3 %v3093_v30  ;;  %v4184_v26 = vld [vmem:[#allocation5 + $0x134] sm:$0xf0]  ;;  %v3649_v30 = vor.u32 %v4341_v19, %v3646_v21  ;;  %v3349_v5 = vor.u32 %v4268_v62, %v3348_v60  ;;  %v3460_v13 = vld [vmem:[#allocation5 + $0x4a8] sm:$0xf] }
  0x8c   :  { %1714 = vmatpush.bf16.msrb.mxu0 %v3585_v36  ;;  %v3013_v35 = vor.u32 %v4184_v26, %v3012_v25  ;;  %v4148_v36 = vld [vmem:[#allocation5 + $0x14] sm:$0xf0]  ;;  %v3316_v22 = vld [vmem:[#allocation5 + $0x388] sm:$0xf] }
  0x8d   :  { %1728 = vmatpush.bf16.msrb.mxu1 %v3713_v38  ;;  %v2996_v38 = vld [vmem:[#allocation5 + $0x108] sm:$0xf]  ;;  %v2869_v50 = vor.u32 %v4148_v36, %v2868_v34  ;;  %v4232_v8 = vld [vmem:[#allocation5 + $0x2b4] sm:$0xf0] }
  0x8e   :  { %v4264_v12 = vld [vmem:[#allocation5 + $0x3b4] sm:$0xf0]  ;;  %v3444_v26 = vld [vmem:[#allocation5 + $0x488] sm:$0xf] }
  0x8f   :  { %1742 = vmatpush.bf16.msrb.mxu2 %v2949_v39  ;;  %1756 = vmatpush.bf16.msrb.mxu3 %v3077_v45  ;;  %v4180_v39 = vld [vmem:[#allocation5 + $0x114] sm:$0xf0]  ;;  %v3505_v45 = vor.u32 %v4305_v28, %v3502_v29  ;;  %v3333_v18 = vor.u32 %v4264_v12, %v3332_v9  ;;  %v3572_v28 = vld [vmem:[#allocation5 + $0x588] sm:$0xf] }
  0x90   :  { %1715 = vmatpush.bf16.msrb.mxu0 %v3569_v51  ;;  %v3620_v51 = vld [vmem:[#allocation5 + $0x5e8] sm:$0xf]  ;;  %v4228_v21 = vld [vmem:[#allocation5 + $0x294] sm:$0xf0] }
  0x91   :  { %1729 = vmatpush.bf16.msrb.mxu1 %v3697_v52  ;;  %v4336_v52 = vld [vmem:[#allocation5 + $0x5f4] sm:$0xf0]  ;;  %v3172_v33 = vld [vmem:[#allocation5 + $0x268] sm:$0xf] }
  0x92   :  { %v3621_v61 = vor.u32 %v4336_v52, %v3620_v51  ;;  %v4260_v25 = vld [vmem:[#allocation5 + $0x394] sm:$0xf0]  ;;  %v3556_v43 = vld [vmem:[#allocation5 + $0x568] sm:$0xf] }
  0x93   :  { %1743 = vmatpush.bf16.msrb.mxu2 %v2933_v53  ;;  %1757 = vmatpush.bf16.msrb.mxu3 %v3061_v58  ;;  %v2997_v53 = vor.u32 %v4180_v39, %v2996_v38  ;;  %v3220_v58 = vld [vmem:[#allocation5 + $0x2c8] sm:$0xf]  ;;  %v4324_v29 = vld [vmem:[#allocation5 + $0x594] sm:$0xf0] }
  0x94   :  { %1716 = vmatpush.bf16.msrb.mxu0 %v3553_v1  ;;  %v4300_v1 = vld [vmem:[#allocation5 + $0x4d4] sm:$0xf0]  ;;  %v3221_v4 = vor.u32 %v4236_v59, %v3220_v58  ;;  %v3573_v36 = vor.u32 %v4324_v29, %v3572_v28  ;;  %v3428_v39 = vld [vmem:[#allocation5 + $0x468] sm:$0xf] }
  0x95   :  { %1730 = vmatpush.bf16.msrb.mxu1 %v3681_v2  ;;  %v3604_v2 = vld [vmem:[#allocation5 + $0x5c8] sm:$0xf]  ;;  %v3477_v6 = vor.u32 %v4300_v1, %v3476_v63  ;;  %v4224_v34 = vld [vmem:[#allocation5 + $0x274] sm:$0xf0] }
  0x96   :  { %v4256_v38 = vld [vmem:[#allocation5 + $0x374] sm:$0xf0]  ;;  %v3156_v48 = vld [vmem:[#allocation5 + $0x248] sm:$0xf] }
  0x97   :  { %1744 = vmatpush.bf16.msrb.mxu2 %v2917_v3  ;;  %1758 = vmatpush.bf16.msrb.mxu3 %v3045_v7  ;;  %v4332_v3 = vld [vmem:[#allocation5 + $0x5d4] sm:$0xf0]  ;;  %v3204_v7 = vld [vmem:[#allocation5 + $0x2a8] sm:$0xf] }
  0x98   :  { %1717 = vmatpush.bf16.msrb.mxu0 %v3537_v14  ;;  %v3605_v10 = vor.u32 %v4332_v3, %v3604_v2  ;;  %v4296_v14 = vld [vmem:[#allocation5 + $0x4b4] sm:$0xf0]  ;;  %v3205_v17 = vor.u32 %v4232_v8, %v3204_v7  ;;  %v3268_v63 = vld [vmem:[#allocation5 + $0x328] sm:$0xf] }
  0x99   :  { %1731 = vmatpush.bf16.msrb.mxu1 %v3665_v15  ;;  %v3588_v15 = vld [vmem:[#allocation5 + $0x5a8] sm:$0xf]  ;;  %v3461_v19 = vor.u32 %v4296_v14, %v3460_v13  ;;  %v4288_v40 = vld [vmem:[#allocation5 + $0x474] sm:$0xf0] }
  0x9a   :  { %v4320_v44 = vld [vmem:[#allocation5 + $0x574] sm:$0xf0]  ;;  %v3429_v47 = vor.u32 %v4288_v40, %v3428_v39  ;;  %v3396_v3 = vld [vmem:[#allocation5 + $0x428] sm:$0xf]  ;;  %v4170_v39 = vld [vmem:[#allocation5 + $0xcc] sm:$0xf] }
  0x9b   :  { %1745 = vmatpush.bf16.msrb.mxu2 %v2901_v16  ;;  %1759 = vmatpush.bf16.msrb.mxu3 %v3029_v20  ;;  %v4328_v16 = vld [vmem:[#allocation5 + $0x5b4] sm:$0xf0]  ;;  %v3188_v20 = vld [vmem:[#allocation5 + $0x288] sm:$0xf]  ;;  %v3557_v51 = vor.u32 %v4320_v44, %v3556_v43  ;;  %v2966_v43 = vld [vmem:[#allocation5 + $0xd8] sm:$0xf0] }
  0x9c   :  { %1718 = vmatpush.bf16.msrb.mxu0 %v3521_v27  ;;  %v3589_v24 = vor.u32 %v4328_v16, %v3588_v15  ;;  %v4292_v27 = vld [vmem:[#allocation5 + $0x494] sm:$0xf0]  ;;  %v3124_v8 = vld [vmem:[#allocation5 + $0x208] sm:$0xf]  ;;  %v4202_v44 = vld [vmem:[#allocation5 + $0x1cc] sm:$0xf] }
  0x9d   :  { %1732 = vmatpush.bf16.msrb.mxu1 %v3649_v30  ;;  %v3189_v30 = vor.u32 %v4228_v21, %v3188_v20  ;;  %v3445_v32 = vor.u32 %v4292_v27, %v3444_v26  ;;  %v4252_v52 = vld [vmem:[#allocation5 + $0x354] sm:$0xf0]  ;;  %v3252_v13 = vld [vmem:[#allocation5 + $0x308] sm:$0xf]  ;;  %v4206_v26 = vld [vmem:[#allocation5 + $0x1ec] sm:$0xf] }
  0x9e   :  { %v4216_v62 = vld [vmem:[#allocation5 + $0x234] sm:$0xf0]  ;;  %v3380_v15 = vld [vmem:[#allocation5 + $0x408] sm:$0xf]  ;;  %v3110_v27 = vld [vmem:[#allocation5 + $0x1f8] sm:$0xf0] }
  0x9f   :  { %1746 = vmatpush.bf16.msrb.mxu2 %v2885_v31  ;;  %1760 = vmatpush.bf16.msrb.mxu3 %v3013_v35  ;;  %v3317_v31 = vor.u32 %v4260_v25, %v3316_v22  ;;  %v3300_v35 = vld [vmem:[#allocation5 + $0x368] sm:$0xf]  ;;  %v4248_v2 = vld [vmem:[#allocation5 + $0x334] sm:$0xf0]  ;;  %v4174_v22 = vld [vmem:[#allocation5 + $0xec] sm:$0xf] }
  0xa0   :  { %1719 = vmatpush.bf16.msrb.mxu0 %v3505_v45  ;;  %v3173_v45 = vor.u32 %v4224_v34, %v3172_v33  ;;  %v3301_v46 = vor.u32 %v4256_v38, %v3300_v35  ;;  %v4212_v9 = vld [vmem:[#allocation5 + $0x214] sm:$0xf0]  ;;  %v3748_v20 = vld [vmem:[#allocation5 + $0x6e8] sm:$0xf]  ;;  %v2982_v25 = vld [vmem:[#allocation5 + $0xf8] sm:$0xf0]  ;;  %v3113_v35 = vor.u32 %v4206_v26, %v3110_v27 }
  0xa1   :  { %1733 = vmatpush.bf16.msrb.mxu1 %v3633_v49  ;;  %v4220_v49 = vld [vmem:[#allocation5 + $0x254] sm:$0xf0]  ;;  %v2985_v34 = vor.u32 %v4174_v22, %v2982_v25  ;;  %v3174_v22 = vld [vmem:[#allocation5 + $0x278] sm:$0xf0]  ;;  %v3668_v27 = vld [vmem:[#allocation5 + $0x648] sm:$0xf] }
  0xa2   :  { %v3157_v58 = vor.u32 %v4220_v49, %v3156_v48  ;;  %v4244_v14 = vld [vmem:[#allocation5 + $0x314] sm:$0xf0]  ;;  %v2969_v49 = vor.u32 %v4170_v39, %v2966_v43 }
  0xa3   :  { %1747 = vmatpush.bf16.msrb.mxu2 %v2869_v50  ;;  %1761 = vmatpush.bf16.msrb.mxu3 %v2997_v53  ;;  %v3284_v50 = vld [vmem:[#allocation5 + $0x348] sm:$0xf]  ;;  %v4368_v21 = vld [vmem:[#allocation5 + $0x6f4] sm:$0xf0]  ;;  %v3253_v28 = vor.u32 %v4244_v14, %v3252_v13 }
  0xa4   :  { %1768 = vmatpush.bf16.msra.mxu0 %v3237_v54  ;;  %1734 = vmatmul.bf16.vlgmr.msrb.gmra.mxu1 %v4817_v41  ;;  %v3412_v53 = vld [vmem:[#allocation5 + $0x448] sm:$0xf]  ;;  %v4284_v54 = vld [vmem:[#allocation5 + $0x454] sm:$0xf0]  ;;  %v3285_v59 = vor.u32 %v4252_v52, %v3284_v50  ;;  %v3749_v33 = vor.u32 %v4368_v21, %v3748_v20  ;;  %v3046_v20 = vld [vmem:[#allocation5 + $0x178] sm:$0xf0] }
  0xa5   :  { %1782 = vmatpush.bf16.msra.mxu1 %v3365_v55  ;;  %1720 = vmatmul.bf16.vlgmr.msrb.gmra.mxu0 %v4819_v42  ;;  %v3540_v55 = vld [vmem:[#allocation5 + $0x548] sm:$0xf]  ;;  %v3413_v60 = vor.u32 %v4284_v54, %v3412_v53  ;;  %v4364_v38 = vld [vmem:[#allocation5 + $0x6d4] sm:$0xf0]  ;;  %v4166_v53 = vld [vmem:[#allocation5 + $0xac] sm:$0xf] }
  0xa6   :  { %1748 = vmatmul.bf16.vlgmr.msrb.gmra.mxu2 %v4803_v57  ;;  %1762 = vmatmul.bf16.vlgmr.msrb.gmra.mxu3 %v4809_v11  ;;  %v4360_v52 = vld [vmem:[#allocation5 + $0x6b4] sm:$0xf0]  ;;  %v3684_v14 = vld [vmem:[#allocation5 + $0x668] sm:$0xf]  ;;  %v4222_v21 = vld [vmem:[#allocation5 + $0x26c] sm:$0xf] }
  0xa7   :  { %1796 = vmatpush.bf16.msra.mxu2 %v3493_v56  ;;  %1810 = vmatpush.bf16.msra.mxu3 %v3621_v61  ;;  %v4316_v56 = vld [vmem:[#allocation5 + $0x554] sm:$0xf0]  ;;  %v3140_v61 = vld [vmem:[#allocation5 + $0x228] sm:$0xf] }
  0xa8   :  { %1769 = vmatpush.bf16.msra.mxu0 %v3221_v4  ;;  %v3541_v1 = vor.u32 %v4316_v56, %v3540_v55  ;;  %v4280_v4 = vld [vmem:[#allocation5 + $0x434] sm:$0xf0]  ;;  %v3141_v7 = vor.u32 %v4216_v62, %v3140_v61  ;;  %v2950_v55 = vld [vmem:[#allocation5 + $0xb8] sm:$0xf0]  ;;  %v4198_v56 = vld [vmem:[#allocation5 + $0x1ac] sm:$0xf] }
  0xa9   :  { %1783 = vmatpush.bf16.msra.mxu1 %v3349_v5  ;;  %v3524_v5 = vld [vmem:[#allocation5 + $0x528] sm:$0xf]  ;;  %v3397_v12 = vor.u32 %v4280_v4, %v3396_v3  ;;  %v2953_v62 = vor.u32 %v4166_v53, %v2950_v55  ;;  %v4162_v3 = vld [vmem:[#allocation5 + $0x8c] sm:$0xf]  ;;  %v4344_v43 = vld [vmem:[#allocation5 + $0x634] sm:$0xf0] }
  0xaa   :  { %v4340_v53 = vld [vmem:[#allocation5 + $0x614] sm:$0xf0] }
  0xab   :  { %1797 = vmatpush.bf16.msra.mxu2 %v3477_v6  ;;  %1811 = vmatpush.bf16.msra.mxu3 %v3605_v10  ;;  %v4312_v6 = vld [vmem:[#allocation5 + $0x534] sm:$0xf0]  ;;  %v3269_v10 = vor.u32 %v4248_v2, %v3268_v63 }
  0xac   :  { %1770 = vmatpush.bf16.msra.mxu0 %v3205_v17  ;;  %v3525_v16 = vor.u32 %v4312_v6, %v3524_v5  ;;  %v4276_v17 = vld [vmem:[#allocation5 + $0x414] sm:$0xf0]  ;;  %v2934_v5 = vld [vmem:[#allocation5 + $0x98] sm:$0xf0]  ;;  %v4194_v6 = vld [vmem:[#allocation5 + $0x18c] sm:$0xf] }
  0xad   :  { %1784 = vmatpush.bf16.msra.mxu1 %v3333_v18  ;;  %v3508_v18 = vld [vmem:[#allocation5 + $0x508] sm:$0xf]  ;;  %v3381_v29 = vor.u32 %v4276_v17, %v3380_v15  ;;  %v4356_v2 = vld [vmem:[#allocation5 + $0x694] sm:$0xf0] }
  0xae   :  { %v4352_v15 = vld [vmem:[#allocation5 + $0x674] sm:$0xf0] }
  0xaf   :  { %1798 = vmatpush.bf16.msra.mxu2 %v3461_v19  ;;  %1812 = vmatpush.bf16.msra.mxu3 %v3589_v24  ;;  %v4308_v19 = vld [vmem:[#allocation5 + $0x514] sm:$0xf0]  ;;  %v3125_v24 = vor.u32 %v4212_v9, %v3124_v8  ;;  %v4226_v8 = vld [vmem:[#allocation5 + $0x28c] sm:$0xf]  ;;  %v3190_v9 = vld [vmem:[#allocation5 + $0x298] sm:$0xf0] }
  0xb0   :  { %1771 = vmatpush.bf16.msra.mxu0 %v3189_v30  ;;  %v4238_v30 = vld [vmem:[#allocation5 + $0x2ec] sm:$0xf]  ;;  %v3193_v17 = vor.u32 %v4226_v8, %v3190_v9 }
  0xb1   :  { %1785 = vmatpush.bf16.msra.mxu1 %v3317_v31  ;;  %v3238_v31 = vld [vmem:[#allocation5 + $0x2f8] sm:$0xf0] }
  0xb2   :  { %v3241_v40 = vor.u32 %v4238_v30, %v3238_v31  ;;  %v3177_v30 = vor.u32 %v4222_v21, %v3174_v22  ;;  %v2902_v31 = vld [vmem:[#allocation5 + $0x58] sm:$0xf0]  ;;  %v4330_v22 = vld [vmem:[#allocation5 + $0x5cc] sm:$0xf] }
  0xb3   :  { %1799 = vmatpush.bf16.msra.mxu2 %v3445_v32  ;;  %1813 = vmatpush.bf16.msra.mxu3 %v3573_v36  ;;  %v3509_v32 = vor.u32 %v4308_v19, %v3508_v18  ;;  %v3732_v36 = vld [vmem:[#allocation5 + $0x6c8] sm:$0xf]  ;;  %v2918_v18 = vld [vmem:[#allocation5 + $0x78] sm:$0xf0]  ;;  %v4190_v19 = vld [vmem:[#allocation5 + $0x16c] sm:$0xf] }
  0xb4   :  { %1772 = vmatpush.bf16.msra.mxu0 %v3173_v45  ;;  %v3094_v45 = vld [vmem:[#allocation5 + $0x1d8] sm:$0xf0]  ;;  %v3733_v48 = vor.u32 %v4364_v38, %v3732_v36  ;;  %v3049_v26 = vor.u32 %v4190_v19, %v3046_v20  ;;  %v4298_v19 = vld [vmem:[#allocation5 + $0x4cc] sm:$0xf] }
  0xb5   :  { %1786 = vmatpush.bf16.msra.mxu1 %v3301_v46  ;;  %v4234_v46 = vld [vmem:[#allocation5 + $0x2cc] sm:$0xf]  ;;  %v3097_v50 = vor.u32 %v4202_v44, %v3094_v45  ;;  %v3478_v21 = vld [vmem:[#allocation5 + $0x4d8] sm:$0xf0] }
  0xb6   :  { %v4150_v44 = vld [vmem:[#allocation5 + $0x2c] sm:$0xf] }
  0xb7   :  { %1800 = vmatpush.bf16.msra.mxu2 %v3429_v47  ;;  %1814 = vmatpush.bf16.msra.mxu3 %v3557_v51  ;;  %v3222_v47 = vld [vmem:[#allocation5 + $0x2d8] sm:$0xf0]  ;;  %v3716_v51 = vld [vmem:[#allocation5 + $0x6a8] sm:$0xf] }
  0xb8   :  { %1773 = vmatpush.bf16.msra.mxu0 %v3157_v58  ;;  %v3225_v54 = vor.u32 %v4234_v46, %v3222_v47  ;;  %v3078_v58 = vld [vmem:[#allocation5 + $0x1b8] sm:$0xf0]  ;;  %v3717_v61 = vor.u32 %v4360_v52, %v3716_v51  ;;  %v4182_v47 = vld [vmem:[#allocation5 + $0x12c] sm:$0xf]  ;;  %v3636_v52 = vld [vmem:[#allocation5 + $0x608] sm:$0xf] }
  0xb9   :  { %1787 = vmatpush.bf16.msra.mxu1 %v3285_v59  ;;  %v4230_v59 = vld [vmem:[#allocation5 + $0x2ac] sm:$0xf]  ;;  %v3081_v63 = vor.u32 %v4198_v56, %v3078_v58  ;;  %v2886_v46 = vld [vmem:[#allocation5 + $0x38] sm:$0xf0] }
  0xba   :  { %v4146_v56 = vld [vmem:[#allocation5 + $0xc] sm:$0xf]  ;;  %v2870_v58 = vld [vmem:[#allocation5 + $0x18] sm:$0xf0] }
  0xbb   :  { %1801 = vmatpush.bf16.msra.mxu2 %v3413_v60  ;;  %1815 = vmatpush.bf16.msra.mxu3 %v3541_v1  ;;  %v3206_v60 = vld [vmem:[#allocation5 + $0x2b8] sm:$0xf0]  ;;  %v3700_v1 = vld [vmem:[#allocation5 + $0x688] sm:$0xf]  ;;  %v2873_v8 = vor.u32 %v4146_v56, %v2870_v58  ;;  %v4286_v56 = vld [vmem:[#allocation5 + $0x46c] sm:$0xf] }
  0xbc   :  { %1774 = vmatpush.bf16.msra.mxu0 %v3141_v7  ;;  %v3209_v4 = vor.u32 %v4230_v59, %v3206_v60  ;;  %v3062_v7 = vld [vmem:[#allocation5 + $0x198] sm:$0xf0]  ;;  %v4178_v59 = vld [vmem:[#allocation5 + $0x10c] sm:$0xf] }
  0xbd   :  { %1788 = vmatpush.bf16.msra.mxu1 %v3269_v10  ;;  %v3701_v10 = vor.u32 %v4356_v2, %v3700_v1  ;;  %v3065_v13 = vor.u32 %v4194_v6, %v3062_v7  ;;  %v4270_v1 = vld [vmem:[#allocation5 + $0x3ec] sm:$0xf]  ;;  %v3366_v2 = vld [vmem:[#allocation5 + $0x3f8] sm:$0xf0] }
  0xbe   :  { %v4334_v6 = vld [vmem:[#allocation5 + $0x5ec] sm:$0xf]  ;;  %v3622_v7 = vld [vmem:[#allocation5 + $0x5f8] sm:$0xf0] }
  0xbf   :  { %1802 = vmatpush.bf16.msra.mxu2 %v3397_v12  ;;  %1816 = vmatpush.bf16.msra.mxu3 %v3525_v16  ;;  %v2937_v12 = vor.u32 %v4162_v3, %v2934_v5  ;;  %v4158_v16 = vld [vmem:[#allocation5 + $0x6c] sm:$0xf]  ;;  %v3494_v5 = vld [vmem:[#allocation5 + $0x4f8] sm:$0xf0] }
  0xc0   :  { %1775 = vmatpush.bf16.msra.mxu0 %v3125_v24  ;;  %v3685_v24 = vor.u32 %v4352_v15, %v3684_v14  ;;  %v2921_v25 = vor.u32 %v4158_v16, %v2918_v18  ;;  %v4302_v3 = vld [vmem:[#allocation5 + $0x4ec] sm:$0xf]  ;;  %v3369_v14 = vor.u32 %v4270_v1, %v3366_v2  ;;  %v3625_v16 = vor.u32 %v4334_v6, %v3622_v7  ;;  %v3350_v18 = vld [vmem:[#allocation5 + $0x3d8] sm:$0xf0] }
  0xc1   :  { %1789 = vmatpush.bf16.msra.mxu1 %v3253_v28  ;;  %v4348_v28 = vld [vmem:[#allocation5 + $0x654] sm:$0xf0]  ;;  %v3497_v15 = vor.u32 %v4302_v3, %v3494_v5  ;;  %v3686_v1 = vld [vmem:[#allocation5 + $0x678] sm:$0xf0]  ;;  %v4843_v2 = vpop.f32.mrf.mxu1  ;;  %v4250_v6 = vld [vmem:[#allocation5 + $0x34c] sm:$0xf] }
  0xc2   :  { %v3669_v36 = vor.u32 %v4348_v28, %v3668_v27  ;;  %v3481_v28 = vor.u32 %v4298_v19, %v3478_v21  ;;  %v3286_v7 = vld [vmem:[#allocation5 + $0x358] sm:$0xf0]  ;;  %v4246_v19 = vld [vmem:[#allocation5 + $0x32c] sm:$0xf] }
  0xc3   :  { %1803 = vmatpush.bf16.msra.mxu2 %v3381_v29  ;;  %1817 = vmatpush.bf16.msra.mxu3 %v3509_v32  ;;  %v4154_v29 = vld [vmem:[#allocation5 + $0x4c] sm:$0xf] }
  0xc4   :  { %1824 = vmatpush.bf16.msrb.mxu0 %v3749_v33  ;;  %1790 = vmatmul.bf16.vlgmr.msra.gmra.mxu1 %v4812_v23  ;;  %v4186_v32 = vld [vmem:[#allocation5 + $0x14c] sm:$0xf]  ;;  %v3030_v33 = vld [vmem:[#allocation5 + $0x158] sm:$0xf0]  ;;  %v2905_v38 = vor.u32 %v4154_v29, %v2902_v31 }
  0xc5   :  { %1838 = vmatpush.bf16.msrb.mxu1 %v2985_v34  ;;  %1776 = vmatmul.bf16.vlgmr.msra.gmra.mxu0 %v4805_v0  ;;  %v4218_v34 = vld [vmem:[#allocation5 + $0x24c] sm:$0xf]  ;;  %v3033_v39 = vor.u32 %v4186_v32, %v3030_v33  ;;  %v3334_v31 = vld [vmem:[#allocation5 + $0x3b8] sm:$0xf0] }
  0xc6   :  { %1804 = vmatmul.bf16.vlgmr.msra.gmra.mxu2 %v4815_v37  ;;  %1818 = vmatmul.bf16.vlgmr.msra.gmra.mxu3 %v4819_v42  ;;  %v4294_v32 = vld [vmem:[#allocation5 + $0x4ac] sm:$0xf] }
  0xc7   :  { %1852 = vmatpush.bf16.msrb.mxu2 %v3113_v35  ;;  %1866 = vmatpush.bf16.msrb.mxu3 %v3241_v40  ;;  %v3158_v35 = vld [vmem:[#allocation5 + $0x258] sm:$0xf0]  ;;  %v3652_v40 = vld [vmem:[#allocation5 + $0x628] sm:$0xf]  ;;  %v4278_v21 = vld [vmem:[#allocation5 + $0x42c] sm:$0xf] }
  0xc8   :  { %1825 = vmatpush.bf16.msrb.mxu0 %v3733_v48  ;;  %v3161_v45 = vor.u32 %v4218_v34, %v3158_v35  ;;  %v3014_v48 = vld [vmem:[#allocation5 + $0x138] sm:$0xf0]  ;;  %v3653_v51 = vor.u32 %v4344_v43, %v3652_v40  ;;  %v4326_v35 = vld [vmem:[#allocation5 + $0x5ac] sm:$0xf] }
  0xc9   :  { %1839 = vmatpush.bf16.msrb.mxu1 %v2969_v49  ;;  %v4214_v49 = vld [vmem:[#allocation5 + $0x22c] sm:$0xf]  ;;  %v3017_v55 = vor.u32 %v4182_v47, %v3014_v48  ;;  %v3462_v34 = vld [vmem:[#allocation5 + $0x4b8] sm:$0xf0] }
  0xca   :  { %v3465_v43 = vor.u32 %v4294_v32, %v3462_v34  ;;  %v4290_v47 = vld [vmem:[#allocation5 + $0x48c] sm:$0xf] }
  0xcb   :  { %1853 = vmatpush.bf16.msrb.mxu2 %v3097_v50  ;;  %1867 = vmatpush.bf16.msrb.mxu3 %v3225_v54  ;;  %v3142_v50 = vld [vmem:[#allocation5 + $0x238] sm:$0xf0]  ;;  %v2889_v54 = vor.u32 %v4150_v44, %v2886_v46  ;;  %v4242_v32 = vld [vmem:[#allocation5 + $0x30c] sm:$0xf] }
  0xcc   :  { %1826 = vmatpush.bf16.msrb.mxu0 %v3717_v61  ;;  %v3145_v60 = vor.u32 %v4214_v49, %v3142_v50  ;;  %v2998_v61 = vld [vmem:[#allocation5 + $0x118] sm:$0xf0]  ;;  %v4322_v50 = vld [vmem:[#allocation5 + $0x58c] sm:$0xf] }
  0xcd   :  { %1840 = vmatpush.bf16.msrb.mxu1 %v2953_v62  ;;  %v4210_v62 = vld [vmem:[#allocation5 + $0x20c] sm:$0xf]  ;;  %v3001_v9 = vor.u32 %v4178_v59, %v2998_v61  ;;  %v3318_v46 = vld [vmem:[#allocation5 + $0x398] sm:$0xf0] }
  0xce   :  { %v3446_v49 = vld [vmem:[#allocation5 + $0x498] sm:$0xf0] }
  0xcf   :  { %1854 = vmatpush.bf16.msrb.mxu2 %v3081_v63  ;;  %1868 = vmatpush.bf16.msrb.mxu3 %v3209_v4  ;;  %v3126_v63 = vld [vmem:[#allocation5 + $0x218] sm:$0xf0]  ;;  %v3637_v4 = vor.u32 %v4340_v53, %v3636_v52  ;;  %v3449_v53 = vor.u32 %v4290_v47, %v3446_v49  ;;  %v3812_v49 = vld [vmem:[#allocation8 + $0x70] sm:$0xf] }
  0xd0   :  { %1827 = vmatpush.bf16.msrb.mxu0 %v3701_v10  ;;  %v4366_v10 = vld [vmem:[#allocation5 + $0x6ec] sm:$0xf]  ;;  %v3702_v52 = vld [vmem:[#allocation5 + $0x698] sm:$0xf0] }
  0xd1   :  { %1841 = vmatpush.bf16.msrb.mxu1 %v2937_v12  ;;  %v3750_v12 = vld [vmem:[#allocation5 + $0x6f8] sm:$0xf0] }
  0xd2   :  { %v3753_v20 = vor.u32 %v4366_v10, %v3750_v12  ;;  %v3430_v59 = vld [vmem:[#allocation5 + $0x478] sm:$0xf0]  ;;  %v4314_v12 = vld [vmem:[#allocation5 + $0x54c] sm:$0xf] }
  0xd3   :  { %1855 = vmatpush.bf16.msrb.mxu2 %v3065_v13  ;;  %1869 = vmatpush.bf16.msrb.mxu3 %v3193_v17  ;;  %v3129_v13 = vor.u32 %v4210_v62, %v3126_v63  ;;  %v4266_v17 = vld [vmem:[#allocation5 + $0x3cc] sm:$0xf]  ;;  %v3558_v61 = vld [vmem:[#allocation5 + $0x578] sm:$0xf0]  ;;  %v4841_v62 = vpop.f32.mrf.mxu0 }
  0xd4   :  { %1828 = vmatpush.bf16.msrb.mxu0 %v3685_v24  ;;  %v3606_v24 = vld [vmem:[#allocation5 + $0x5d8] sm:$0xf0]  ;;  %v3353_v27 = vor.u32 %v4266_v17, %v3350_v18  ;;  %v4350_v63 = vld [vmem:[#allocation5 + $0x66c] sm:$0xf]  ;;  %v4849_v47 = vpop.f32.mrf.mxu3 }
  0xd5   :  { %1842 = vmatpush.bf16.msrb.mxu1 %v2921_v25  ;;  %v4362_v25 = vld [vmem:[#allocation5 + $0x6cc] sm:$0xf]  ;;  %v3609_v29 = vor.u32 %v4330_v22, %v3606_v24  ;;  %v3414_v10 = vld [vmem:[#allocation5 + $0x458] sm:$0xf0]  ;;  %v4845_v22 = vpop.f32.mrf.mxu2 }
  0xd7   :  { %1856 = vmatpush.bf16.msrb.mxu2 %v3049_v26  ;;  %1870 = vmatpush.bf16.msrb.mxu3 %v3177_v30  ;;  %v3734_v26 = vld [vmem:[#allocation5 + $0x6d8] sm:$0xf0]  ;;  %v4262_v30 = vld [vmem:[#allocation5 + $0x3ac] sm:$0xf] }
  0xd8   :  { %1829 = vmatpush.bf16.msrb.mxu0 %v3669_v36  ;;  %v3737_v33 = vor.u32 %v4362_v25, %v3734_v26  ;;  %v3590_v36 = vld [vmem:[#allocation5 + $0x5b8] sm:$0xf0]  ;;  %v3337_v40 = vor.u32 %v4262_v30, %v3334_v31  ;;  %v4310_v26 = vld [vmem:[#allocation5 + $0x52c] sm:$0xf]  ;;  %v4847_v30 = vld [vmem:[#allocation7] sm:$0xf] }
  0xd9   :  { %1843 = vmatpush.bf16.msrb.mxu1 %v2905_v38  ;;  %v4358_v38 = vld [vmem:[#allocation5 + $0x6ac] sm:$0xf]  ;;  %v3593_v44 = vor.u32 %v4326_v35, %v3590_v36  ;;  %v3398_v25 = vld [vmem:[#allocation5 + $0x438] sm:$0xf0] }
  0xda   :  { %v3401_v34 = vor.u32 %v4278_v21, %v3398_v25  ;;  %v3254_v36 = vld [vmem:[#allocation5 + $0x318] sm:$0xf0] }
  0xdb   :  { %1857 = vmatpush.bf16.msrb.mxu2 %v3033_v39  ;;  %1871 = vmatpush.bf16.msrb.mxu3 %v3161_v45  ;;  %v3718_v39 = vld [vmem:[#allocation5 + $0x6b8] sm:$0xf0]  ;;  %v4258_v45 = vld [vmem:[#allocation5 + $0x38c] sm:$0xf] }
  0xdc   :  { %1830 = vmatpush.bf16.msrb.mxu0 %v3653_v51  ;;  %v3721_v48 = vor.u32 %v4358_v38, %v3718_v39  ;;  %v4354_v51 = vld [vmem:[#allocation5 + $0x68c] sm:$0xf]  ;;  %v3382_v39 = vld [vmem:[#allocation5 + $0x418] sm:$0xf0] }
  0xdd   :  { %1844 = vmatpush.bf16.msrb.mxu1 %v2889_v54  ;;  %v4254_v54 = vld [vmem:[#allocation5 + $0x36c] sm:$0xf]  ;;  %v3705_v58 = vor.u32 %v4354_v51, %v3702_v52  ;;  %v3876_v51 = vld [vmem:[#allocation8 + $0xf0] sm:$0xf]  ;;  %v4400_v52 = vld [vmem:[#allocation8 + $0xf4] sm:$0xf0] }
  0xde   :  { %v4274_v38 = vld [vmem:[#allocation5 + $0x40c] sm:$0xf] }
  0xdf   :  { %1858 = vmatpush.bf16.msrb.mxu2 %v3017_v55  ;;  %1872 = vmatpush.bf16.msrb.mxu3 %v3145_v60  ;;  %v3302_v55 = vld [vmem:[#allocation5 + $0x378] sm:$0xf0]  ;;  %v4318_v60 = vld [vmem:[#allocation5 + $0x56c] sm:$0xf] }
  0xe0   :  { %1831 = vmatpush.bf16.msrb.mxu0 %v3637_v4  ;;  %v3305_v3 = vor.u32 %v4254_v54, %v3302_v55  ;;  %v3433_v4 = vor.u32 %v4286_v56, %v3430_v59  ;;  %v3561_v5 = vor.u32 %v4318_v60, %v3558_v61  ;;  %v3804_v56 = vld [vmem:[#allocation8 + $0x60] sm:$0xf]  ;;  %v3877_v59 = vor.u32 %v4400_v52, %v3876_v51  ;;  %v1583_v60 = vpop.f32.mrf.mxu2 }
  0xe1   :  { %1845 = vmatpush.bf16.msrb.mxu1 %v2873_v8  ;;  %v4282_v8 = vld [vmem:[#allocation5 + $0x44c] sm:$0xf]  ;;  %v3868_v61 = vld [vmem:[#allocation8 + $0xe0] sm:$0xf]  ;;  %v381_v52 = vperm.slane %v4847_v30, 1 }
  0xe2   :  { %v3417_v17 = vor.u32 %v4282_v8, %v3414_v10  ;;  %v3860_v10 = vld [vmem:[#allocation8 + $0xd0] sm:$0xf] }
  0xe3   :  { %1859 = vmatpush.bf16.msrb.mxu2 %v3001_v9  ;;  %1873 = vmatpush.bf16.msrb.mxu3 %v3129_v13  ;;  %v3689_v9 = vor.u32 %v4350_v63, %v3686_v1  ;;  %v3542_v13 = vld [vmem:[#allocation5 + $0x558] sm:$0xf0]  ;;  %v4398_v63 = vld [vmem:[#allocation8 + $0xe4] sm:$0xf0] }
  0xe4   :  { %1880 = vmatpush.bf16.msra.mxu0 %v3369_v14  ;;  %1846 = vmatmul.bf16.vlgmr.msrb.gmra.mxu1 %v4803_v57  ;;  %v4346_v14 = vld [vmem:[#allocation5 + $0x64c] sm:$0xf]  ;;  %v3545_v18 = vor.u32 %v4314_v12, %v3542_v13  ;;  %v3869_v8 = vor.u32 %v4398_v63, %v3868_v61  ;;  %v3820_v61 = vld [vmem:[#allocation8 + $0x80] sm:$0xf] }
  0xe5   :  { %1894 = vmatpush.bf16.msra.mxu1 %v3497_v15  ;;  %1832 = vmatmul.bf16.vlgmr.msrb.gmra.mxu0 %v4817_v41  ;;  %v3670_v15 = vld [vmem:[#allocation5 + $0x658] sm:$0xf0]  ;;  %v4386_v63 = vld [vmem:[#allocation8 + $0x84] sm:$0xf0] }
  0xe6   :  { %1860 = vmatmul.bf16.vlgmr.msrb.gmra.mxu2 %v4809_v11  ;;  %1874 = vmatmul.bf16.vlgmr.msrb.gmra.mxu3 %v4805_v0  ;;  %v3574_v11 = vld [vmem:[#allocation5 + $0x598] sm:$0xf0]  ;;  %v3321_v0 = vor.u32 %v4258_v45, %v3318_v46  ;;  %v3673_v24 = vor.u32 %v4346_v14, %v3670_v15  ;;  %v4338_v46 = vld [vmem:[#allocation5 + $0x60c] sm:$0xf]  ;;  %v1597_v14 = vpop.f32.mrf.mxu3 }
  0xe7   :  { %1908 = vmatpush.bf16.msra.mxu2 %v3625_v16  ;;  %1922 = vmatpush.bf16.msra.mxu3 %v3753_v20  ;;  %v3577_v57 = vor.u32 %v4322_v50, %v3574_v11  ;;  %v3289_v16 = vor.u32 %v4250_v6, %v3286_v7  ;;  %v3270_v20 = vld [vmem:[#allocation5 + $0x338] sm:$0xf0]  ;;  %v3257_v11 = vor.u32 %v4242_v32, %v3254_v36  ;;  %v3796_v6 = vld [vmem:[#allocation8 + $0x50] sm:$0xf]  ;;  %v3836_v36 = vld [vmem:[#allocation8 + $0xa0] sm:$0xf] }
  0xe8   :  { %1881 = vmatpush.bf16.msra.mxu0 %v3353_v27  ;;  %v3526_v27 = vld [vmem:[#allocation5 + $0x538] sm:$0xf0]  ;;  %v3273_v31 = vor.u32 %v4246_v19, %v3270_v20  ;;  %v4394_v19 = vld [vmem:[#allocation8 + $0xc4] sm:$0xf0] }
  0xe9   :  { %1895 = vmatpush.bf16.msra.mxu1 %v3481_v28  ;;  %v4342_v28 = vld [vmem:[#allocation5 + $0x62c] sm:$0xf]  ;;  %v3529_v35 = vor.u32 %v4310_v26, %v3526_v27  ;;  %v3510_v45 = vld [vmem:[#allocation5 + $0x518] sm:$0xf0]  ;;  %v3844_v26 = vld [vmem:[#allocation8 + $0xb0] sm:$0xf] }
  0xea   :  { %v4384_v50 = vld [vmem:[#allocation8 + $0x74] sm:$0xf0] }
  0xeb   :  { %1909 = vmatpush.bf16.msra.mxu2 %v3609_v29  ;;  %1923 = vmatpush.bf16.msra.mxu3 %v3737_v33  ;;  %v3654_v29 = vld [vmem:[#allocation5 + $0x638] sm:$0xf0]  ;;  %v1555_v33 = vpop.f32.mrf.mxu0  ;;  %v3813_v55 = vor.u32 %v4384_v50, %v3812_v49 }
  0xec   :  { %1882 = vmatpush.bf16.msra.mxu0 %v3337_v40  ;;  %v1569_v40 = vpop.f32.mrf.mxu1  ;;  %v4380_v7 = vld [vmem:[#allocation8 + $0x54] sm:$0xf0] }
  0xed   :  { %1896 = vmatpush.bf16.msra.mxu1 %v3465_v43  ;;  %v3657_v43 = vor.u32 %v4342_v28, %v3654_v29  ;;  %v3797_v15 = vor.u32 %v4380_v7, %v3796_v6  ;;  %v4388_v49 = vld [vmem:[#allocation8 + $0x94] sm:$0xf0] }
  0xef   :  { %1910 = vmatpush.bf16.msra.mxu2 %v3593_v44  ;;  %1924 = vmatpush.bf16.msra.mxu3 %v3721_v48  ;;  %v4306_v44 = vld [vmem:[#allocation5 + $0x50c] sm:$0xf]  ;;  %v3638_v48 = vld [vmem:[#allocation5 + $0x618] sm:$0xf0] }
  0xf0   :  { %1883 = vmatpush.bf16.msra.mxu0 %v3321_v0  ;;  %v380_v0 = vperm.slane %v4847_v30, 0  ;;  %v3641_v54 = vor.u32 %v4338_v46, %v3638_v48  ;;  %v3828_v48 = vld [vmem:[#allocation8 + $0x90] sm:$0xf] }
  0xf1   :  { %1897 = vmatpush.bf16.msra.mxu1 %v3449_v53  ;;  %v3385_v53 = vor.u32 %v4274_v38, %v3382_v39  ;;  %v4390_v38 = vld [vmem:[#allocation8 + $0xa4] sm:$0xf0] }
  0xf2   :  { %v1554_v1 = vadd.f32 %v4841_v62, %v380_v0  ;;  %v4396_v62 = vld [vmem:[#allocation8 + $0xd4] sm:$0xf0]  ;;  %v3837_v46 = vor.u32 %v4390_v38, %v3836_v36 }
  0xf3   :  { %1911 = vmatpush.bf16.msra.mxu2 %v3577_v57  ;;  %1925 = vmatpush.bf16.msra.mxu3 %v3705_v58  ;;  %v3513_v57 = vor.u32 %v4306_v44, %v3510_v45  ;;  %v4382_v58 = vld [vmem:[#allocation8 + $0x64] sm:$0xf0]  ;;  %v3764_v44 = vld [vmem:[#allocation8 + $0x10] sm:$0xf]  ;;  %v4372_v45 = vld [vmem:[#allocation8 + $0x14] sm:$0xf0] }
  0xf4   :  { %1884 = vmatpush.bf16.msra.mxu0 %v3305_v3  ;;  %v1556_v3 = vadd.f32 %v1555_v33, %v380_v0  ;;  %v1568_v12 = vadd.f32 %v4843_v2, %v1554_v1  ;;  %v4376_v2 = vld [vmem:[#allocation8 + $0x34] sm:$0xf0] }
  0xf5   :  { %1898 = vmatpush.bf16.msra.mxu1 %v3433_v4  ;;  %v3805_v4 = vor.u32 %v4382_v58, %v3804_v56  ;;  %v4370_v56 = vld [vmem:[#allocation8 + $0x4] sm:$0xf0]  ;;  %v4383_v58 = vld [vmem:[#allocation8 + $0x74] sm:$0xf] }
  0xf6   :  { %v1570_v13 = vadd.f32 %v1569_v40, %v1556_v3  ;;  %v4399_v3 = vld [vmem:[#allocation8 + $0xf4] sm:$0xf] }
  0xf7   :  { %1912 = vmatpush.bf16.msra.mxu2 %v3561_v5  ;;  %1926 = vmatpush.bf16.msra.mxu3 %v3689_v9  ;;  %v1609_v5 = vpop.f32.mrf.mxu0  ;;  %v1623_v9 = vpop.f32.mrf.mxu1 }
  0xf8   :  { %1885 = vmatpush.bf16.msra.mxu0 %v3289_v16  ;;  %v4378_v16 = vld [vmem:[#allocation8 + $0x44] sm:$0xf0]  ;;  %v1584_v20 = vadd.f32 %v1583_v60, %v1570_v13  ;;  %v3814_v60 = vld [vmem:[#allocation8 + $0x78] sm:$0xf0] }
  0xf9   :  { %1899 = vmatpush.bf16.msra.mxu1 %v3417_v17  ;;  %v3861_v17 = vor.u32 %v4396_v62, %v3860_v10  ;;  %v4381_v10 = vld [vmem:[#allocation8 + $0x64] sm:$0xf]  ;;  %v3806_v62 = vld [vmem:[#allocation8 + $0x68] sm:$0xf0] }
  0xfa   :  { %v1598_v28 = vadd.f32 %v1597_v14, %v1584_v20 }
  0xfb   :  { %1913 = vmatpush.bf16.msra.mxu2 %v3545_v18  ;;  %1927 = vmatpush.bf16.msra.mxu3 %v3673_v24  ;;  %v3852_v18 = vld [vmem:[#allocation8 + $0xc0] sm:$0xf]  ;;  %v3780_v24 = vld [vmem:[#allocation8 + $0x30] sm:$0xf] }
  0xfc   :  { %1886 = vmatpush.bf16.msra.mxu0 %v3273_v31  ;;  %v3853_v25 = vor.u32 %v4394_v19, %v3852_v18  ;;  %v1651_v31 = vpop.f32.mrf.mxu3  ;;  %v3781_v33 = vor.u32 %v4376_v2, %v3780_v24  ;;  %v3809_v19 = vor.u32 %v4381_v10, %v3806_v62  ;;  %v3766_v62 = vld [vmem:[#allocation8 + $0x18] sm:$0xf0] }
  0xfd   :  { %1900 = vmatpush.bf16.msra.mxu1 %v3401_v34  ;;  %v3772_v34 = vld [vmem:[#allocation8 + $0x20] sm:$0xf] }
  0xff   :  { %1914 = vmatpush.bf16.msra.mxu2 %v3529_v35  ;;  %1928 = vmatpush.bf16.msra.mxu3 %v3657_v43  ;;  %v1611_v29 = vpop.f32.mrf.mxu0  ;;  %v1625_v32 = vpop.f32.mrf.mxu1 }
 0x100   :  { %1887 = vmatpush.bf16.msra.mxu0 %v3257_v11  ;;  %v1612_v40 = vadd.f32 %v1611_v29, %v1598_v28  ;;  %v4377_v29 = vld [vmem:[#allocation8 + $0x44] sm:$0xf] }
 0x101   :  { %1901 = vmatpush.bf16.msra.mxu1 %v3385_v53  ;;  %v3765_v53 = vor.u32 %v4372_v45, %v3764_v44  ;;  %v4375_v44 = vld [vmem:[#allocation8 + $0x34] sm:$0xf] }
 0x102   :  { %v1626_v11 = vadd.f32 %v1625_v32, %v1612_v40 }
 0x103   :  { %1915 = vmatpush.bf16.msra.mxu2 %v3513_v57  ;;  %1929 = vmatpush.bf16.msra.mxu3 %v3641_v54 }
 0x104   :  { %2338 = vmatpush.bf16.msrb.mxu0 %v3813_v55  ;;  %1902 = vmatmul.bf16.vlgmr.msra.gmra.mxu1 %v4815_v37  ;;  %v1582_v37 = vadd.f32 %v4845_v22, %v1568_v12  ;;  %v4374_v22 = vld [vmem:[#allocation8 + $0x24] sm:$0xf0]  ;;  %v1653_v54 = vpop.f32.mrf.mxu3  ;;  %v3756_v55 = vld [vmem:[#allocation8] sm:$0xf] }
 0x105   :  { %1888 = vmatmul.bf16.vlgmr.msra.gmra.mxu0 %v4812_v23  ;;  %2352 = vmatpush.bf16.msrb.mxu1 %v3877_v59  ;;  %v3788_v23 = vld [vmem:[#allocation8 + $0x40] sm:$0xf]  ;;  %v3773_v43 = vor.u32 %v4374_v22, %v3772_v34  ;;  %v3829_v59 = vor.u32 %v4388_v49, %v3828_v48  ;;  %v3757_v6 = vor.u32 %v4370_v56, %v3756_v55  ;;  %v3854_v34 = vld [vmem:[#allocation8 + $0xc8] sm:$0xf0]  ;;  %v3940_v22 = vld [vmem:[#allocation8 + $0x170] sm:$0xf] }
 0x106   :  { %1916 = vmatmul.bf16.vlgmr.msra.gmra.mxu2 %v4819_v42  ;;  %1930 = vmatmul.bf16.vlgmr.msra.gmra.mxu3 %v4817_v41  ;;  %v1637_v42 = vpop.f32.mrf.mxu2  ;;  %v3789_v21 = vor.u32 %v4378_v16, %v3788_v23  ;;  %v4392_v41 = vld [vmem:[#allocation8 + $0xb4] sm:$0xf0]  ;;  %v1596_v27 = vadd.f32 %v4849_v47, %v1582_v37  ;;  %v3870_v23 = vld [vmem:[#allocation8 + $0xe8] sm:$0xf0]  ;;  %v1654_v37 = vadd.f32 %v1653_v54, %v381_v52  ;;  %v3932_v49 = vld [vmem:[#allocation8 + $0x160] sm:$0xf] }
 0x107   :  { %v3845_v35 = vor.u32 %v4392_v41, %v3844_v26  ;;  %v1665_v51 = vpop.f32.mrf.mxu0  ;;  %v1679_v0 = vpop.f32.mrf.mxu1  ;;  %v3862_v26 = vld [vmem:[#allocation8 + $0xd8] sm:$0xf0]  ;;  %v4373_v56 = vld [vmem:[#allocation8 + $0x24] sm:$0xf] }
 0x108   :  { %2339 = vmatpush.bf16.msrb.mxu0 %v3805_v4  ;;  %v1610_v39 = vadd.f32 %v1609_v5, %v1596_v27  ;;  %v3878_v4 = vld [vmem:[#allocation8 + $0xf8] sm:$0xf0]  ;;  %v1652_v5 = vadd.f32 %v1651_v31, %v381_v52  ;;  %v3790_v31 = vld [vmem:[#allocation8 + $0x48] sm:$0xf0] }
 0x109   :  { %2353 = vmatpush.bf16.msrb.mxu1 %v3869_v8  ;;  %v3817_v8 = vor.u32 %v4383_v58, %v3814_v60  ;;  %v3881_v12 = vor.u32 %v4399_v3, %v3878_v4  ;;  %v3774_v58 = vld [vmem:[#allocation8 + $0x28] sm:$0xf0]  ;;  %v4389_v60 = vld [vmem:[#allocation8 + $0xa4] sm:$0xf] }
 0x10a   :  { %v1624_v50 = vadd.f32 %v1623_v9, %v1610_v39  ;;  %v3821_v9 = vor.u32 %v4386_v63, %v3820_v61  ;;  %v1666_v16 = vadd.f32 %v1665_v51, %v1652_v5  ;;  %v3846_v51 = vld [vmem:[#allocation8 + $0xb8] sm:$0xf0]  ;;  %v3838_v61 = vld [vmem:[#allocation8 + $0xa8] sm:$0xf0]  ;;  %v3924_v63 = vld [vmem:[#allocation8 + $0x150] sm:$0xf] }
 0x10c   :  { %2340 = vmatpush.bf16.msrb.mxu0 %v3797_v15  ;;  %v1638_v1 = vadd.f32 %v1637_v42, %v1624_v50  ;;  %v4397_v15 = vld [vmem:[#allocation8 + $0xe4] sm:$0xf]  ;;  %v4379_v42 = vld [vmem:[#allocation8 + $0x54] sm:$0xf]  ;;  %v1707_v2 = vpop.f32.mrf.mxu3  ;;  %v1680_v41 = vadd.f32 %v1679_v0, %v1666_v16  ;;  %v4414_v50 = vld [vmem:[#allocation8 + $0x164] sm:$0xf0] }
 0x10d   :  { %2354 = vmatpush.bf16.msrb.mxu1 %v3861_v17  ;;  %v3873_v24 = vor.u32 %v4397_v15, %v3870_v23  ;;  %v3933_v52 = vor.u32 %v4414_v50, %v3932_v49  ;;  %v4387_v16 = vld [vmem:[#allocation8 + $0x94] sm:$0xf] }
 0x10e   :  { %v1639_v47 = vpop.f32.mrf.mxu2  ;;  %v1936_v13 = vmax.f32 %v1638_v1, 0.0  ;;  %v4412_v1 = vld [vmem:[#allocation8 + $0x154] sm:$0xf0] }
 0x10f   :  { %v1640_v57 = vadd.f32 %v1639_v47, %v1626_v11  ;;  %v1667_v18 = vpop.f32.mrf.mxu0  ;;  %v1681_v20 = vpop.f32.mrf.mxu1  ;;  %v3782_v47 = vld [vmem:[#allocation8 + $0x38] sm:$0xf0]  ;;  %v4391_v11 = vld [vmem:[#allocation8 + $0xb4] sm:$0xf]  ;;  %v3925_v4 = vor.u32 %v4412_v1, %v3924_v63  ;;  %v3988_v1 = vld [vmem:[#allocation8 + $0x1d0] sm:$0xf] }
 0x110   :  { %2341 = vmatpush.bf16.msrb.mxu0 %v3789_v21  ;;  %v3798_v21 = vld [vmem:[#allocation8 + $0x58] sm:$0xf0]  ;;  %v1668_v28 = vadd.f32 %v1667_v18, %v1654_v37  ;;  %v3785_v54 = vor.u32 %v4375_v44, %v3782_v47  ;;  %v4413_v47 = vld [vmem:[#allocation8 + $0x164] sm:$0xf] }
 0x111   :  { %2355 = vmatpush.bf16.msrb.mxu1 %v3853_v25  ;;  %v1940_v7 = vmax.f32 %v1640_v57, 0.0  ;;  %v4395_v25 = vld [vmem:[#allocation8 + $0xd4] sm:$0xf]  ;;  %v3801_v27 = vor.u32 %v4379_v42, %v3798_v21  ;;  %v3830_v18 = vld [vmem:[#allocation8 + $0x98] sm:$0xf0] }
 0x112   :  { %v3865_v32 = vor.u32 %v4395_v25, %v3862_v26  ;;  %v1682_v45 = vadd.f32 %v1681_v20, %v1668_v28  ;;  %v4369_v42 = vld [vmem:[#allocation8 + $0x4] sm:$0xf]  ;;  %v3758_v21 = vld [vmem:[#allocation8 + $0x8] sm:$0xf0]  ;;  %v4408_v25 = vld [vmem:[#allocation8 + $0x134] sm:$0xf0] }
 0x113   :  { %v4861_v17 = vpack.c.bf16 %v1940_v7, %v1936_v13  ;;  %v4371_v7 = vld [vmem:[#allocation8 + $0x14] sm:$0xf]  ;;  %v3916_v13 = vld [vmem:[#allocation8 + $0x140] sm:$0xf]  ;;  %v3942_v44 = vld [vmem:[#allocation8 + $0x178] sm:$0xf0] }
 0x114   :  { %2342 = vmatpush.bf16.msrb.mxu0 %v3781_v33  ;;  %v4393_v33 = vld [vmem:[#allocation8 + $0xc4] sm:$0xf]  ;;  %v1709_v57 = vpop.f32.mrf.mxu3 }
 0x115   :  { %2356 = vmatpush.bf16.msrb.mxu1 %v3845_v35  ;;  %v4416_v35 = vld [vmem:[#allocation8 + $0x174] sm:$0xf0]  ;;  %v3857_v48 = vor.u32 %v4393_v33, %v3854_v34 }
 0x116   :  { %v1693_v14 = vpop.f32.mrf.mxu2  ;;  %v3941_v38 = vor.u32 %v4416_v35, %v3940_v22  ;;  %v3892_v22 = vld [vmem:[#allocation8 + $0x110] sm:$0xf]  ;;  %v4404_v35 = vld [vmem:[#allocation8 + $0x114] sm:$0xf0] }
 0x117   :  { %v1694_v36 = vadd.f32 %v1693_v14, %v1680_v41  ;;  %v4410_v14 = vld [vmem:[#allocation8 + $0x144] sm:$0xf0]  ;;  %v4385_v41 = vld [vmem:[#allocation8 + $0x84] sm:$0xf] }
 0x118   :  { %2343 = vmatpush.bf16.msrb.mxu0 %v3773_v43  ;;  %v3793_v43 = vor.u32 %v4377_v29, %v3790_v31  ;;  %2366 = vmatpush.bf16.msrb.mxu2 %v3941_v38  ;;  %v3917_v15 = vor.u32 %v4410_v14, %v3916_v13  ;;  %v3761_v29 = vor.u32 %v4369_v42, %v3758_v21  ;;  %v3900_v31 = vld [vmem:[#allocation8 + $0x120] sm:$0xf]  ;;  %v3902_v13 = vld [vmem:[#allocation8 + $0x128] sm:$0xf0] }
 0x119   :  { %2357 = vmatpush.bf16.msrb.mxu1 %v3837_v46  ;;  %v1708_v0 = vadd.f32 %v1707_v2, %v1694_v36  ;;  %v3908_v2 = vld [vmem:[#allocation8 + $0x130] sm:$0xf]  ;;  %v3893_v36 = vor.u32 %v4404_v35, %v3892_v22  ;;  %v3884_v38 = vld [vmem:[#allocation8 + $0x100] sm:$0xf] }
 0x11a   :  { %v3909_v28 = vor.u32 %v4408_v25, %v3908_v2  ;;  %v3964_v25 = vld [vmem:[#allocation8 + $0x1a0] sm:$0xf] }
 0x11c   :  { %2344 = vmatpush.bf16.msrb.mxu0 %v3765_v53  ;;  %2367 = vmatpush.bf16.msrb.mxu2 %v3933_v52  ;;  %v4411_v52 = vld [vmem:[#allocation8 + $0x154] sm:$0xf] }
 0x11d   :  { %2358 = vmatpush.bf16.msrb.mxu1 %v3829_v59  ;;  %v3849_v59 = vor.u32 %v4391_v11, %v3846_v51  ;;  %v4004_v11 = vld [vmem:[#allocation8 + $0x1f0] sm:$0xf]  ;;  %v4432_v51 = vld [vmem:[#allocation8 + $0x1f4] sm:$0xf0] }
 0x11e   :  { %v1695_v39 = vpop.f32.mrf.mxu2 }
 0x11f   :  { %v1696_v53 = vadd.f32 %v1695_v39, %v1682_v45  ;;  %v4402_v39 = vld [vmem:[#allocation8 + $0x104] sm:$0xf0] }
 0x120   :  { %2345 = vmatpush.bf16.msrb.mxu0 %v3757_v6  ;;  %v3777_v6 = vor.u32 %v4373_v56, %v3774_v58  ;;  %2368 = vmatpush.bf16.msrb.mxu2 %v3925_v4  ;;  %v4407_v4 = vld [vmem:[#allocation8 + $0x134] sm:$0xf] }
 0x121   :  { %2359 = vmatpush.bf16.msrb.mxu1 %v3821_v9  ;;  %v1735_v46 = vpop.f32.mrf.mxu1  ;;  %v1710_v3 = vadd.f32 %v1709_v57, %v1696_v53  ;;  %v3926_v53 = vld [vmem:[#allocation8 + $0x158] sm:$0xf0]  ;;  %v3996_v57 = vld [vmem:[#allocation8 + $0x1e0] sm:$0xf] }
 0x122   :  { %v1721_v40 = vpop.f32.mrf.mxu0 }
 0x123   :  { %2346 = vmatmul.bf16.vlgmr.msrb.gmra.mxu0 %v4861_v17  ;;  %v1722_v55 = vadd.f32 %v1721_v40, %v1708_v0  ;;  %v3885_v40 = vor.u32 %v4402_v39, %v3884_v38  ;;  %v4005_v0 = vor.u32 %v4432_v51, %v4004_v11  ;;  %v3956_v38 = vld [vmem:[#allocation8 + $0x190] sm:$0xf]  ;;  %v4420_v39 = vld [vmem:[#allocation8 + $0x194] sm:$0xf0]  ;;  %v4431_v51 = vld [vmem:[#allocation8 + $0x1f4] sm:$0xf] }
 0x124   :  { %2394 = vmatpush.bf16.msra.mxu0 %v3817_v8  ;;  %2369 = vmatpush.bf16.msrb.mxu2 %v3917_v15 }
 0x125   :  { %2408 = vmatpush.bf16.msra.mxu1 %v3881_v12  ;;  %v1736_v8 = vadd.f32 %v1735_v46, %v1722_v55  ;;  %v3841_v12 = vor.u32 %v4389_v60, %v3838_v61  ;;  %2380 = vmatpush.bf16.msrb.mxu3 %v4005_v0  ;;  %v4409_v55 = vld [vmem:[#allocation8 + $0x144] sm:$0xf]  ;;  %v382_v60 = vperm.slane %v4847_v30, 2 }
 0x127   :  { %v1937_v37 = vmax.f32 %v1736_v8, 0.0  ;;  %v3980_v8 = vld [vmem:[#allocation8 + $0x1c0] sm:$0xf] }
 0x128   :  { %2395 = vmatpush.bf16.msra.mxu0 %v3809_v19  ;;  %v3769_v19 = vor.u32 %v4371_v7, %v3766_v62  ;;  %2370 = vmatpush.bf16.msrb.mxu2 %v3909_v28  ;;  %v3910_v7 = vld [vmem:[#allocation8 + $0x138] sm:$0xf0]  ;;  %v3886_v28 = vld [vmem:[#allocation8 + $0x108] sm:$0xf0] }
 0x129   :  { %2409 = vmatpush.bf16.msra.mxu1 %v3873_v24  ;;  %v1737_v10 = vpop.f32.mrf.mxu1  ;;  %v3833_v24 = vor.u32 %v4387_v16, %v3830_v18  ;;  %v1749_v46 = vpop.f32.mrf.mxu2  ;;  %v3913_v62 = vor.u32 %v4407_v4, %v3910_v7  ;;  %v4424_v16 = vld [vmem:[#allocation8 + $0x1b4] sm:$0xf0]  ;;  %v3982_v7 = vld [vmem:[#allocation8 + $0x1c8] sm:$0xf0] }
 0x12a   :  { %v1723_v5 = vpop.f32.mrf.mxu0  ;;  %v1763_v50 = vpop.f32.mrf.mxu3 }
 0x12b   :  { %v1724_v9 = vadd.f32 %v1723_v5, %v1710_v3  ;;  %v4428_v3 = vld [vmem:[#allocation8 + $0x1d4] sm:$0xf0] }
 0x12c   :  { %2396 = vmatpush.bf16.msra.mxu0 %v3801_v27  ;;  %v3822_v27 = vld [vmem:[#allocation8 + $0x88] sm:$0xf0] }
 0x12d   :  { %2410 = vmatpush.bf16.msra.mxu1 %v3865_v32  ;;  %v1738_v23 = vadd.f32 %v1737_v10, %v1724_v9  ;;  %v4406_v32 = vld [vmem:[#allocation8 + $0x124] sm:$0xf0]  ;;  %v3825_v34 = vor.u32 %v4385_v41, %v3822_v27  ;;  %v1750_v10 = vadd.f32 %v1749_v46, %v382_v60  ;;  %v4401_v27 = vld [vmem:[#allocation8 + $0x104] sm:$0xf] }
 0x12e   :  { %v3901_v33 = vor.u32 %v4406_v32, %v3900_v31  ;;  %v4426_v9 = vld [vmem:[#allocation8 + $0x1c4] sm:$0xf0] }
 0x12f   :  { %v1941_v20 = vmax.f32 %v1738_v23, 0.0  ;;  %v3981_v14 = vor.u32 %v4426_v9, %v3980_v8  ;;  %v3972_v23 = vld [vmem:[#allocation8 + $0x1b0] sm:$0xf] }
 0x130   :  { %2397 = vmatpush.bf16.msra.mxu0 %v3793_v43  ;;  %2371 = vmatpush.bf16.msrb.mxu2 %v3901_v33  ;;  %v4415_v43 = vld [vmem:[#allocation8 + $0x174] sm:$0xf] }
 0x131   :  { %2411 = vmatpush.bf16.msra.mxu1 %v3857_v48  ;;  %v1945_v26 = vpack.c.bf16 %v1941_v20, %v1937_v37  ;;  %v3945_v45 = vor.u32 %v4415_v43, %v3942_v44  ;;  %v3934_v48 = vld [vmem:[#allocation8 + $0x168] sm:$0xf0]  ;;  %v1751_v56 = vpop.f32.mrf.mxu2  ;;  %v3894_v37 = vld [vmem:[#allocation8 + $0x118] sm:$0xf0]  ;;  %v1764_v20 = vadd.f32 %v1763_v50, %v1750_v10  ;;  %v3957_v44 = vor.u32 %v4420_v39, %v3956_v38 }
 0x132   :  { %v3937_v49 = vor.u32 %v4413_v47, %v3934_v48  ;;  %v1765_v5 = vpop.f32.mrf.mxu3  ;;  %v1752_v42 = vadd.f32 %v1751_v56, %v382_v60  ;;  %v3948_v48 = vld [vmem:[#allocation8 + $0x180] sm:$0xf]  ;;  %v3998_v56 = vld [vmem:[#allocation8 + $0x1e8] sm:$0xf0] }
 0x133   :  { %2360 = vmatmul.bf16.vlgmr.msrb.gmra.mxu1 %v1945_v26 }
 0x134   :  { %2398 = vmatpush.bf16.msra.mxu0 %v3785_v54  ;;  %2372 = vmatpush.bf16.msrb.mxu2 %v3893_v36  ;;  %v4430_v54 = vld [vmem:[#allocation8 + $0x1e4] sm:$0xf0] }
 0x135   :  { %2412 = vmatpush.bf16.msra.mxu1 %v3849_v59  ;;  %v3997_v58 = vor.u32 %v4430_v54, %v3996_v57  ;;  %v3918_v59 = vld [vmem:[#allocation8 + $0x148] sm:$0xf0] }
 0x136   :  { %v3921_v61 = vor.u32 %v4409_v55, %v3918_v59  ;;  %v4429_v55 = vld [vmem:[#allocation8 + $0x1e4] sm:$0xf] }
 0x137   :  { %2381 = vmatpush.bf16.msrb.mxu3 %v3997_v58  ;;  %v4001_v59 = vor.u32 %v4429_v55, %v3998_v56  ;;  %v4447_v55 = vld [vmem:[#allocation10 + $0x70] sm:$0xff]  ;;  %v4434_v56 = vld [vmem:[#allocation10 + $0x8] sm:$0xff] }
 0x138   :  { %2399 = vmatpush.bf16.msra.mxu0 %v3777_v6  ;;  %2373 = vmatpush.bf16.msrb.mxu2 %v3885_v40  ;;  %v3989_v6 = vor.u32 %v4428_v3, %v3988_v1  ;;  %v3990_v1 = vld [vmem:[#allocation8 + $0x1d8] sm:$0xf0] }
 0x139   :  { %2413 = vmatpush.bf16.msra.mxu1 %v3841_v12  ;;  %v4405_v12 = vld [vmem:[#allocation8 + $0x124] sm:$0xf] }
 0x13a   :  { %v3905_v15 = vor.u32 %v4405_v12, %v3902_v13  ;;  %v3974_v12 = vld [vmem:[#allocation8 + $0x1b8] sm:$0xf0]  ;;  %v383_v13 = vperm.slane %v4847_v30, 3 }
 0x13b   :  { %2382 = vmatpush.bf16.msrb.mxu3 %v3989_v6  ;;  %v4425_v6 = vld [vmem:[#allocation8 + $0x1c4] sm:$0xf] }
 0x13c   :  { %2400 = vmatpush.bf16.msra.mxu0 %v3769_v19  ;;  %2422 = vmatpush.bf16.msra.mxu2 %v3945_v45  ;;  %v4403_v19 = vld [vmem:[#allocation8 + $0x114] sm:$0xf]  ;;  %v3985_v8 = vor.u32 %v4425_v6, %v3982_v7  ;;  %v2012_v6 = vld [vmem:[%s4889_s4] sm:$0x3] }
 0x13d   :  { %2414 = vmatpush.bf16.msra.mxu1 %v3833_v24  ;;  %v3973_v24 = vor.u32 %v4424_v16, %v3972_v23  ;;  %v3897_v2 = vor.u32 %v4403_v19, %v3894_v37  ;;  %v3966_v23 = vld [vmem:[#allocation8 + $0x1a8] sm:$0xf0]  ;;  %v4441_v7 = vld [vmem:[#allocation10 + $0x40] sm:$0xff] }
 0x13f   :  { %2383 = vmatpush.bf16.msrb.mxu3 %v3981_v14 }
 0x140   :  { %2401 = vmatpush.bf16.msra.mxu0 %v3761_v29  ;;  %2423 = vmatpush.bf16.msra.mxu2 %v3937_v49  ;;  %v1766_v29 = vadd.f32 %v1765_v5, %v1752_v42  ;;  %v4418_v49 = vld [vmem:[#allocation8 + $0x184] sm:$0xf0]  ;;  %v3958_v42 = vld [vmem:[#allocation8 + $0x198] sm:$0xf0] }
 0x141   :  { %2415 = vmatpush.bf16.msra.mxu1 %v3825_v34  ;;  %v1791_v18 = vpop.f32.mrf.mxu1  ;;  %v3889_v34 = vor.u32 %v4401_v27, %v3886_v28  ;;  %v3949_v11 = vor.u32 %v4418_v49, %v3948_v48  ;;  %v3950_v27 = vld [vmem:[#allocation8 + $0x188] sm:$0xf0] }
 0x142   :  { %v1777_v63 = vpop.f32.mrf.mxu0 }
 0x143   :  { %2402 = vmatmul.bf16.vlgmr.msra.gmra.mxu0 %v4861_v17  ;;  %v3929_v17 = vor.u32 %v4411_v52, %v3926_v53  ;;  %v1778_v31 = vadd.f32 %v1777_v63, %v1764_v20  ;;  %2384 = vmatpush.bf16.msrb.mxu3 %v3973_v24  ;;  %v4006_v52 = vld [vmem:[#allocation8 + $0x1f8] sm:$0xf0]  ;;  %v4427_v63 = vld [vmem:[#allocation8 + $0x1d4] sm:$0xf] }
 0x144   :  { %2416 = vmatmul.bf16.vlgmr.msra.gmra.mxu1 %v1945_v26  ;;  %v4422_v26 = vld [vmem:[#allocation8 + $0x1a4] sm:$0xf0]  ;;  %v4009_v53 = vor.u32 %v4431_v51, %v4006_v52  ;;  %v3993_v4 = vor.u32 %v4427_v63, %v3990_v1  ;;  %v4419_v20 = vld [vmem:[#allocation8 + $0x194] sm:$0xf]  ;;  %v4440_v51 = vld [vmem:[#allocation10 + $0x38] sm:$0xff] }
 0x145   :  { %2424 = vmatpush.bf16.msra.mxu2 %v3929_v17  ;;  %v3965_v33 = vor.u32 %v4422_v26, %v3964_v25  ;;  %v1792_v22 = vadd.f32 %v1791_v18, %v1778_v31  ;;  %2588 = vmatpush.bf16.msrb.mxu0 %v4440_v51  ;;  %v4439_v52 = vld [vmem:[#allocation10 + $0x30] sm:$0xff]  ;;  %v4449_v51 = vld [vmem:[#allocation11] sm:$0xff] }
 0x146   :  { %v4443_v63 = vld [vmem:[#allocation10 + $0x50] sm:$0xff] }
 0x147   :  { %2385 = vmatpush.bf16.msrb.mxu3 %v3965_v33 }
 0x149   :  { %2425 = vmatpush.bf16.msra.mxu2 %v3921_v61  ;;  %v1805_v21 = vpop.f32.mrf.mxu2  ;;  %v1819_v32 = vpop.f32.mrf.mxu3  ;;  %2589 = vmatpush.bf16.msrb.mxu0 %v4439_v52  ;;  %v4464_v52 = vld [vmem:[#allocation13 + $0x38] sm:$0xff] }
 0x14a   :  { %v1779_v41 = vpop.f32.mrf.mxu0  ;;  %v1793_v36 = vpop.f32.mrf.mxu1  ;;  %v1806_v45 = vadd.f32 %v1805_v21, %v1792_v22  ;;  %v4417_v21 = vld [vmem:[#allocation8 + $0x184] sm:$0xf] }
 0x14b   :  { %v1780_v35 = vadd.f32 %v1779_v41, %v1766_v29  ;;  %2386 = vmatpush.bf16.msrb.mxu3 %v3957_v44  ;;  %v3961_v41 = vor.u32 %v4419_v20, %v3958_v42  ;;  %v3953_v30 = vor.u32 %v4417_v21, %v3950_v27 }
 0x14c   :  { %v1820_v0 = vadd.f32 %v1819_v32, %v1806_v45 }
 0x14d   :  { %2426 = vmatpush.bf16.msra.mxu2 %v3913_v62  ;;  %v1794_v46 = vadd.f32 %v1793_v36, %v1780_v35  ;;  %v4423_v62 = vld [vmem:[#allocation8 + $0x1b4] sm:$0xf] }
 0x14e   :  { %v3977_v14 = vor.u32 %v4423_v62, %v3974_v12 }
 0x14f   :  { %2387 = vmatpush.bf16.msrb.mxu3 %v3949_v11 }
 0x151   :  { %2427 = vmatpush.bf16.msra.mxu2 %v3905_v15  ;;  %v1807_v40 = vpop.f32.mrf.mxu2  ;;  %v1821_v50 = vpop.f32.mrf.mxu3  ;;  %v4421_v15 = vld [vmem:[#allocation8 + $0x1a4] sm:$0xf] }
 0x152   :  { %v1808_v47 = vadd.f32 %v1807_v40, %v1794_v46  ;;  %v3969_v16 = vor.u32 %v4421_v15, %v3966_v23 }
 0x153   :  { %2436 = vmatpush.bf16.msra.mxu3 %v4009_v53  ;;  %v4437_v53 = vld [vmem:[#allocation10 + $0x20] sm:$0xff] }
 0x154   :  { %v1822_v17 = vadd.f32 %v1821_v50, %v1808_v47 }
 0x155   :  { %2428 = vmatpush.bf16.msra.mxu2 %v3897_v2 }
 0x157   :  { %2437 = vmatpush.bf16.msra.mxu3 %v4001_v59  ;;  %v4433_v59 = vld [vmem:[#allocation10] sm:$0xff] }
 0x159   :  { %2429 = vmatpush.bf16.msra.mxu2 %v3889_v34 }
 0x15b   :  { %2438 = vmatpush.bf16.msra.mxu3 %v3993_v4 }
 0x15f   :  { %2439 = vmatpush.bf16.msra.mxu3 %v3985_v8  ;;  %v2014_v8 = vperm.slane %v2012_v6, 0 }
 0x161   :  { %v1847_v5 = vpop.f32.mrf.mxu1 }
 0x162   :  { %v1833_v43 = vpop.f32.mrf.mxu0  ;;  %v1848_v19 = vadd.f32 %v1847_v5, %v383_v13  ;;  %v4442_v5 = vld [vmem:[#allocation10 + $0x48] sm:$0xff] }
 0x163   :  { %v1834_v57 = vadd.f32 %v1833_v43, %v1820_v0  ;;  %2440 = vmatpush.bf16.msra.mxu3 %v3977_v14  ;;  %v4438_v0 = vld [vmem:[#allocation10 + $0x28] sm:$0xff] }
 0x164   :  { %2590 = vmatpush.bf16.msrb.mxu0 %v4438_v0  ;;  %v4463_v0 = vld [vmem:[#allocation13 + $0x30] sm:$0xff] }
 0x165   :  { %v1938_v60 = vmax.f32 %v1834_v57, 0.0  ;;  %v4448_v57 = vld [vmem:[#allocation10 + $0x78] sm:$0xff] }
 0x166   :  { %2602 = vmatpush.bf16.msrb.mxu1 %v4448_v57 }
 0x167   :  { %2441 = vmatpush.bf16.msra.mxu3 %v3969_v16 }
 0x168   :  { %2591 = vmatpush.bf16.msrb.mxu0 %v4437_v53  ;;  %v4462_v53 = vld [vmem:[#allocation13 + $0x28] sm:$0xff] }
 0x169   :  { %v1861_v9 = vpop.f32.mrf.mxu2  ;;  %v1875_v10 = vpop.f32.mrf.mxu3 }
 0x16a   :  { %v1835_v54 = vpop.f32.mrf.mxu0  ;;  %v1849_v18 = vpop.f32.mrf.mxu1  ;;  %v1862_v24 = vadd.f32 %v1861_v9, %v1848_v19  ;;  %2603 = vmatpush.bf16.msrb.mxu1 %v4447_v55  ;;  %v4481_v55 = vld [vmem:[%s4891_s6] ss:$0 sm:$0xff] }
 0x16b   :  { %v1836_v58 = vadd.f32 %v1835_v54, %v1822_v17  ;;  %v1850_v2 = vadd.f32 %v1849_v18, %v383_v13  ;;  %2442 = vmatpush.bf16.msra.mxu3 %v3961_v41  ;;  %v4436_v17 = vld [vmem:[#allocation10 + $0x18] sm:$0xff]  ;;  %v4435_v54 = vld [vmem:[#allocation10 + $0x10] sm:$0xff] }
 0x16c   :  { %v1876_v29 = vadd.f32 %v1875_v10, %v1862_v24  ;;  %2592 = vmatpush.bf16.msrb.mxu0 %v4436_v17  ;;  %v4461_v17 = vld [vmem:[#allocation13 + $0x20] sm:$0xff] }
 0x16d   :  { %v1942_v61 = vmax.f32 %v1836_v58, 0.0  ;;  %v4446_v58 = vld [vmem:[#allocation10 + $0x68] sm:$0xff] }
 0x16e   :  { %2604 = vmatpush.bf16.msrb.mxu1 %v4446_v58 }
 0x16f   :  { %v1946_v3 = vpack.c.bf16 %v1942_v61, %v1938_v60  ;;  %2443 = vmatpush.bf16.msra.mxu3 %v3953_v30  ;;  %v4445_v60 = vld [vmem:[#allocation10 + $0x60] sm:$0xff]  ;;  %v4444_v61 = vld [vmem:[#allocation10 + $0x58] sm:$0xff] }
 0x170   :  { %2593 = vmatpush.bf16.msrb.mxu0 %v4435_v54 }
 0x171   :  { %2374 = vmatmul.bf16.vlgmr.msrb.gmra.mxu2 %v1946_v3  ;;  %v1863_v37 = vpop.f32.mrf.mxu2  ;;  %v1877_v25 = vpop.f32.mrf.mxu3 }
 0x172   :  { %v1864_v31 = vadd.f32 %v1863_v37, %v1850_v2  ;;  %2605 = vmatpush.bf16.msrb.mxu1 %v4445_v60 }
 0x174   :  { %v1878_v34 = vadd.f32 %v1877_v25, %v1864_v31  ;;  %2594 = vmatpush.bf16.msrb.mxu0 %v4434_v56 }
 0x176   :  { %2606 = vmatpush.bf16.msrb.mxu1 %v4444_v61 }
 0x178   :  { %2595 = vmatpush.bf16.msrb.mxu0 %v4433_v59 }
 0x17a   :  { %2607 = vmatpush.bf16.msrb.mxu1 %v4443_v63 }
 0x17e   :  { %2608 = vmatpush.bf16.msrb.mxu1 %v4442_v5  ;;  %v4460_v5 = vld [vmem:[#allocation13 + $0x18] sm:$0xff] }
 0x181   :  { %2430 = vmatmul.bf16.vlgmr.msra.gmra.mxu2 %v1946_v3  ;;  %v1903_v28 = vpop.f32.mrf.mxu1 }
 0x182   :  { %v1889_v26 = vpop.f32.mrf.mxu0  ;;  %2609 = vmatpush.bf16.msrb.mxu1 %v4441_v7  ;;  %v4458_v7 = vld [vmem:[#allocation13 + $0x8] sm:$0xff] }
 0x183   :  { %v1890_v32 = vadd.f32 %v1889_v26, %v1876_v29  ;;  %v2015_v26 = vperm.slane %v2012_v6, 1  ;;  %v4459_v6 = vld [vmem:[#allocation13 + $0x10] sm:$0xff] }
 0x185   :  { %v1904_v36 = vadd.f32 %v1903_v28, %v1890_v32 }
 0x189   :  { %v1917_v33 = vpop.f32.mrf.mxu2  ;;  %v1931_v22 = vpop.f32.mrf.mxu3 }
 0x18a   :  { %v1891_v35 = vpop.f32.mrf.mxu0  ;;  %v1918_v39 = vadd.f32 %v1917_v33, %v1904_v36  ;;  %v1905_v40 = vpop.f32.mrf.mxu1 }
 0x18b   :  { %v1892_v38 = vadd.f32 %v1891_v35, %v1878_v34 }
 0x18c   :  { %v1932_v45 = vadd.f32 %v1931_v22, %v1918_v39 }
 0x18d   :  { %v1906_v43 = vadd.f32 %v1905_v40, %v1892_v38 }
 0x18e   :  { %v1939_v49 = vmax.f32 %v1932_v45, 0.0  ;;  %v4456_v45 = vld [vmem:[#allocation11 + $0x38] sm:$0xff] }
 0x18f   :  { %2687 = vmatpush.bf16.msrb.mxu2 %v4456_v45 }
 0x191   :  { %v1919_v44 = vpop.f32.mrf.mxu2  ;;  %v1933_v47 = vpop.f32.mrf.mxu3 }
 0x192   :  { %v1920_v46 = vadd.f32 %v1919_v44, %v1906_v43 }
 0x194   :  { %v1934_v48 = vadd.f32 %v1933_v47, %v1920_v46  ;;  %v4455_v46 = vld [vmem:[#allocation11 + $0x30] sm:$0xff]  ;;  %v4454_v47 = vld [vmem:[#allocation11 + $0x28] sm:$0xff] }
 0x195   :  { %2688 = vmatpush.bf16.msrb.mxu2 %v4455_v46 }
 0x196   :  { %v1943_v50 = vmax.f32 %v1934_v48, 0.0  ;;  %v4453_v48 = vld [vmem:[#allocation11 + $0x20] sm:$0xff] }
 0x198   :  { %v1947_v11 = vpack.c.bf16 %v1943_v50, %v1939_v49  ;;  %v4452_v49 = vld [vmem:[#allocation11 + $0x18] sm:$0xff]  ;;  %v4451_v50 = vld [vmem:[#allocation11 + $0x10] sm:$0xff] }
 0x199   :  { %2689 = vmatpush.bf16.msrb.mxu2 %v4454_v47 }
 0x19a   :  { %2388 = vmatmul.bf16.vlgmr.msrb.gmra.mxu3 %v1947_v11 }
 0x19b   :  { %2772 = vmatpush.bf16.msrb.mxu3 %v4464_v52 }
 0x19d   :  { %2690 = vmatpush.bf16.msrb.mxu2 %v4453_v48 }
 0x19f   :  { %2773 = vmatpush.bf16.msrb.mxu3 %v4463_v0 }
 0x1a0   :  { %v2347_v1 = vpop.f32.mrf.mxu0 }
 0x1a1   :  { %v2348_v13 = vadd.f32 %v2347_v1, %v2014_v8  ;;  %2691 = vmatpush.bf16.msrb.mxu2 %v4452_v49 }
 0x1a3   :  { %2774 = vmatpush.bf16.msrb.mxu3 %v4462_v53 }
 0x1a5   :  { %2692 = vmatpush.bf16.msrb.mxu2 %v4451_v50 }
 0x1a7   :  { %2775 = vmatpush.bf16.msrb.mxu3 %v4461_v17 }
 0x1a8   :  { %v2349_v9 = vpop.f32.mrf.mxu0 }
 0x1a9   :  { %v2350_v14 = vadd.f32 %v2349_v9, %v2014_v8  ;;  %v4457_v8 = vld [vmem:[#allocation13] sm:$0xff] }
 0x1aa   :  { %2444 = vmatmul.bf16.vlgmr.msra.gmra.mxu3 %v1947_v11  ;;  %v4450_v11 = vld [vmem:[#allocation11 + $0x8] sm:$0xff] }
 0x1ab   :  { %2693 = vmatpush.bf16.msrb.mxu2 %v4450_v11  ;;  %2776 = vmatpush.bf16.msrb.mxu3 %v4460_v5 }
 0x1af   :  { %2694 = vmatpush.bf16.msrb.mxu2 %v4449_v51  ;;  %2777 = vmatpush.bf16.msrb.mxu3 %v4459_v6 }
 0x1b0   :  { %v2361_v3 = vpop.f32.mrf.mxu1 }
 0x1b1   :  { %v2362_v15 = vadd.f32 %v2361_v3, %v2348_v13 }
 0x1b3   :  { %2778 = vmatpush.bf16.msrb.mxu3 %v4458_v7 }
 0x1b7   :  { %2779 = vmatpush.bf16.msrb.mxu3 %v4457_v8 }
 0x1b8   :  { %v2363_v10 = vpop.f32.mrf.mxu1 }
 0x1b9   :  { %v2364_v23 = vadd.f32 %v2363_v10, %v2350_v14  ;;  %v4482_v10 = vld [vmem:[%s4893_s8] ss:$0 sm:$0xff]  ;;  %s4709_s8 = smov [#allocation14]  }
 0x1c0   :  { %v2403_v18 = vpop.f32.mrf.mxu0 }
 0x1c1   :  { %v2417_v20 = vpop.f32.mrf.mxu1  ;;  %v2404_v28 = vadd.f32 %v2403_v18, %v2015_v26 }
 0x1c3   :  { %v2418_v32 = vadd.f32 %v2417_v20, %v2404_v28 }
 0x1c8   :  { %v2405_v27 = vpop.f32.mrf.mxu0 }
 0x1c9   :  { %v2419_v29 = vpop.f32.mrf.mxu1  ;;  %v2406_v31 = vadd.f32 %v2405_v27, %v2015_v26 }
 0x1cb   :  { %v2420_v34 = vadd.f32 %v2419_v29, %v2406_v31 }
 0x1f4   :  { %v2375_v4 = vpop.f32.mrf.mxu2 }
 0x1f5   :  { %v2376_v16 = vadd.f32 %v2375_v4, %v2362_v15 }
 0x1fc   :  { %v2377_v62 = vpop.f32.mrf.mxu2 }
 0x1fd   :  { %v2378_v19 = vadd.f32 %v2377_v62, %v2364_v23 }
 0x204   :  { %v2431_v24 = vpop.f32.mrf.mxu2 }
 0x205   :  { %v2432_v22 = vadd.f32 %v2431_v24, %v2418_v32 }
 0x20c   :  { %v2433_v33 = vpop.f32.mrf.mxu2 }
 0x20d   :  { %v2434_v35 = vadd.f32 %v2433_v33, %v2420_v34 }
 0x21d   :  { %v2389_v12 = vpop.f32.mrf.mxu3 }
 0x21e   :  { %v2390_v37 = vadd.f32 %v2389_v12, %v2376_v16  ;;  %v4483_v16 = vld [vmem:[%s4895_s10] ss:$0 sm:$0xff]  ;;  %s2812_s10 = sshll.u32 %s4709_s8, 4  ;;  %s2813_s10 = int_to_ptr.vmem [resolvable:$true] %s2812_s10 }
 0x220   :  { %v2450_v2 = vmax.f32 %v2390_v37, 0.0 }
 0x225   :  { %v2391_v42 = vpop.f32.mrf.mxu3 }
 0x226   :  { %v2392_v21 = vadd.f32 %v2391_v42, %v2378_v19 }
 0x228   :  { %v2452_v25 = vmax.f32 %v2392_v21, 0.0 }
 0x22a   :  { %v2454_v41 = vpack.c.bf16 %v2452_v25, %v2450_v2 }
 0x22c   :  { %2596 = vmatmul.bf16.vlgmr.msrb.gmra.mxu0 %v2454_v41 }
 0x22d   :  { %v2445_v30 = vpop.f32.mrf.mxu3 }
 0x22e   :  { %v2446_v36 = vadd.f32 %v2445_v30, %v2432_v22 }
 0x230   :  { %v2451_v40 = vmax.f32 %v2446_v36, 0.0 }
 0x235   :  { %v2447_v38 = vpop.f32.mrf.mxu3 }
 0x236   :  { %v2448_v39 = vadd.f32 %v2447_v38, %v2434_v35 }
 0x238   :  { %v2453_v43 = vmax.f32 %v2448_v39, 0.0 }
 0x23a   :  { %v2455_v44 = vpack.c.bf16 %v2453_v43, %v2451_v40 }
 0x23c   :  { %2610 = vmatmul.bf16.vlgmr.msrb.gmra.mxu1 %v2455_v44 }
 0x2a9   :  { %v2597_v57 = vpop.f32.mrf.mxu0 }
 0x2aa   :  { %v2598_v58 = vadd.f32 %v4481_v55, %v2597_v57 }
 0x2b1   :  { %v2599_v56 = vpop.f32.mrf.mxu0 }
 0x2b2   :  { %v2600_v59 = vadd.f32 %v4481_v55, %v2599_v56 }
 0x2b9   :  { %v2611_v54 = vpop.f32.mrf.mxu1 }
 0x2ba   :  { %v2612_v60 = vadd.f32 %v2611_v54, %v2598_v58 }
 0x2bc   :  { %v2616_v1 = vmax.f32 %v2612_v60, 0.0 }
 0x2c1   :  { %v2613_v61 = vpop.f32.mrf.mxu1 }
 0x2c2   :  { %v2614_v63 = vadd.f32 %v2613_v61, %v2600_v59 }
 0x2c4   :  { %v2617_v3 = vmax.f32 %v2614_v63, 0.0 }
 0x2c6   :  { %v2618_v4 = vpack.c.bf16 %v2617_v3, %v2616_v1 }
 0x2c8   :  { %2695 = vmatmul.bf16.vlgmr.msrb.gmra.mxu2 %v2618_v4 }
 0x34b   :  { %v2696_v9 = vpop.f32.mrf.mxu2 }
 0x34c   :  { %v2697_v62 = vadd.f32 %v4482_v10, %v2696_v9 }
 0x34e   :  { %v2701_v14 = vmax.f32 %v2697_v62, 0.0 }
 0x353   :  { %v2698_v12 = vpop.f32.mrf.mxu2 }
 0x354   :  { %v2699_v13 = vadd.f32 %v4482_v10, %v2698_v12 }
 0x356   :  { %v2702_v15 = vmax.f32 %v2699_v13, 0.0 }
 0x358   :  { %v2703_v23 = vpack.c.bf16 %v2702_v15, %v2701_v14 }
 0x35a   :  { %2780 = vmatmul.bf16.vlgmr.msrb.gmra.mxu3 %v2703_v23 }
 0x3dd   :  { %v2781_v18 = vpop.f32.mrf.mxu3 }
 0x3de   :  { %v2782_v19 = vadd.f32 %v4483_v16, %v2781_v18 }
 0x3e0   :  { %2786 = vmax.xlane.f32.xlu0 %v2782_v19 }
 0x3e5   :  { %v2783_v37 = vpop.f32.mrf.mxu3 }
 0x3e6   :  { %v2784_v20 = vadd.f32 %v4483_v16, %v2783_v37 }
 0x3e8   :  { %2788 = vmax.xlane.f32.xlu0 %v2784_v20 }
 0x453   :  { %v2787_v42 = vpop.xlane.xlu0 %2786 }
 0x454   :  { %v2790_v21 = vsub.f32 %v2782_v19, %v2787_v42 }
 0x456   :  { %v2792_v24 = vmul.f32 1.442695, %v2790_v21 }
 0x458   :  { %4484 = vpow2.f32 %v2792_v24 }
 0x45b   :  { %v2789_v2 = vpop.xlane.xlu0 %2788 }
 0x45c   :  { %v2791_v25 = vsub.f32 %v2784_v20, %v2789_v2 }
 0x45e   :  { %v4485_v26 = vpop.eup %4484  ;;  %v2794_v41 = vmul.f32 1.442695, %v2791_v25 }
 0x45f   :  { %2796 = vadd.xlane.f32.xlu1 %v4485_v26 }
 0x460   :  { %4486 = vpow2.f32 %v2794_v41 }
 0x466   :  { %v4487_v27 = vpop.eup %4486 }
 0x467   :  { %2798 = vadd.xlane.f32.xlu1 %v4487_v27 }
 0x4d2   :  { %v2797_v30 = vpop.xlane.xlu1 %2796 }
 0x4d3   :  { %4488 = vlog2.f32 %v2797_v30 }
 0x4d9   :  { %v4489_v28 = vpop.eup %4488 }
 0x4da   :  { %v2801_v29 = vmul.f32 0.6931472, %v4489_v28  ;;  %v2799_v31 = vpop.xlane.xlu1 %2798 }
 0x4db   :  { %4490 = vlog2.f32 %v2799_v31 }
 0x4dc   :  { %v2804_v32 = vsub.f32 %v2790_v21, %v2801_v29 }
 0x4de   :  { %2806 = vst [vmem:[#allocation14] sm:$0xff] %v2804_v32 }
 0x4e1   :  { %v4491_v33 = vpop.eup %4490 }
 0x4e2   :  { %v2803_v34 = vmul.f32 0.6931472, %v4491_v33 }
 0x4e4   :  { %v2805_v22 = vsub.f32 %v2791_v25, %v2803_v34 }
 0x4e6   :  { %2807 = vst [vmem:[#allocation14 + $0x8] sm:$0xff] %v2805_v22 }
 0x4e7   :  { %2820 = dma.vmem_to_hbm [thread:$0]  %s2813_s10, 256, %s2815_s7, [#allocation4], %s4698_s29, %s4698_s29, %s4699_s30  }
 0x4e8   :  { %4692 = dma.done.wait [#allocation4], 256  }
 0x4e9   :  { %4693 = vsyncadd [#allocation4], 4294967040 }
 0x4ea   :  { %2825 = vsyncpa [#allocation3], 1 }
 0x4eb   :  { %2826 = vsyncpa [#allocation6], 1 }
 0x4ec   :  { %2827 = vsyncpa [#allocation9], 1 }
 0x4ed   :  { %2828 = vsyncpa [#allocation12], 1 }
 0x4ee   :  { %2829 = vsyncpa [#allocation4], 1 }

</bundles_post_ra>
